<compile_context>
chip_gen: v6e
topology: v6e:2x2x1
jax: 0.10.0
libtpu: 0.0.40
codegen_flags: <defaults>
</compile_context>

<pallas_src>
import functools

import jax
import jax.numpy as jnp
from jax import lax
from jax.experimental import pallas as pl
from jax.experimental.pallas import tpu as pltpu

_LANE = 128      # pad feature dims to multiples of the lane width
_SUBLANE = 8     # batch tiles stay multiples of the sublane width


def _round_up(n, m):
    return ((n + m - 1) // m) * m


def _cdiv(a, b):
    return (a + b - 1) // b


def _vmem_ceiling_bytes():
    """Hardware VMEM capacity minus headroom (v5e/v6e: 128 MiB, v7x: 64 MiB)."""
    try:
        cap = int(pltpu.get_tpu_info().vmem_capacity_bytes)
    except Exception:
        cap = 64 << 20                       # conservative (v7x-sized) fallback
    frac = 0.8 if cap >= (100 << 20) else 0.75
    return int(cap * frac)


def _mlp_mask_kernel(num_layers, out_pads, *refs):
    """refs (all VMEM):
      refs[0]          : x       [TILE_B, IN_PAD]        (compute dtype: bf16 or f32)
      refs[1]          : mask    [TILE_B, OUT_PAD]       (bf16 on the bf16 path)
      refs[2 : 2+L]    : W_l     [OUT_l_PAD, IN_l_PAD]   (PyTorch [out, in] layout)
      refs[2+L]        : biases  [L, MAX_OUT_PAD]        (f32, packed)
      refs[-1]         : out     [TILE_B, OUT_PAD]
    Weights/biases use constant block indices (VMEM-resident across the batch grid).
    """
    x_ref, mask_ref = refs[0], refs[1]
    w_refs = refs[2:2 + num_layers]
    b_ref = refs[2 + num_layers]
    o_ref = refs[-1]

    h = x_ref[...]                                    # already compute dtype
    for l, w_ref in enumerate(w_refs):
        acc = lax.dot_general(                        # h @ W_l.T on the MXU, f32 accum
            h.astype(w_ref.dtype), w_ref[...],
            dimension_numbers=(((1,), (1,)), ((), ())),
            preferred_element_type=jnp.float32)
        bias = b_ref[l:l + 1, :out_pads[l]]           # (1, out_pad_l), static slice
        h = jnp.maximum(acc + bias, 0.0)              # bias + ReLU in f32 (VPU)
    # mask multiply in f32, then a lane-dense 128-wide store in the output dtype
    o_ref[...] = (h * mask_ref[...].astype(jnp.float32)).astype(o_ref.dtype)


def pack_params(weights, biases, *, compute_dtype=jnp.bfloat16):
    """One-time parameter packing (keep OUT of the per-call hot path).

    weights[l]: [out_l, in_l] (PyTorch layout), biases[l]: [out_l].
    Feature dims are zero-padded to multiples of 128 (zero rows/lanes are inert
    through Linear + ReLU).  Weights are cast to `compute_dtype` (bf16 default for
    v6e/v7x MXU; pass jnp.float32 for a bit-tight path).  Biases are packed into a
    single [L, MAX_OUT_PAD] f32 table (one resident operand instead of L).
    NOTE: int8 weights are deliberately not offered - the v7x MXU has no integer path.
    """
    compute_dtype = jnp.dtype(compute_dtype)
    dims = [int(weights[0].shape[1])] + [int(w.shape[0]) for w in weights]
    pads = [_round_up(d, _LANE) for d in dims]
    max_out_pad = max(pads[1:])
    w_p = []
    b_packed = jnp.zeros((len(weights), max_out_pad), jnp.float32)
    for l, (w, b) in enumerate(zip(weights, biases)):
        out_d, in_d = int(w.shape[0]), int(w.shape[1])
        wp = jnp.zeros((pads[l + 1], pads[l]), compute_dtype)
        wp = wp.at[:out_d, :in_d].set(jnp.asarray(w, compute_dtype))
        w_p.append(wp)
        b_packed = b_packed.at[l, :out_d].set(jnp.asarray(b, jnp.float32))
    return dict(weights=w_p, biases=b_packed, dims=dims, pads=pads,
                compute_dtype=compute_dtype)


def customized_nn_forward(x, mask, packed, *, tile_b=512, out_dtype=jnp.float32):
    """Pallas forward: y = mask * ReLU(... ReLU(x @ W0.T + b0) ... @ WL.T + bL)."""
    w_p, b_packed = packed["weights"], packed["biases"]
    dims, pads = packed["dims"], packed["pads"]
    cdt = packed["compute_dtype"]
    num_layers = len(w_p)
    in_dim, out_dim = dims[0], dims[-1]
    in_pad, out_pad = pads[0], pads[-1]

    mask_dt = jnp.dtype(jnp.bfloat16) if cdt == jnp.bfloat16 else jnp.dtype(jnp.float32)
    out_dtype = jnp.dtype(out_dtype)

    batch = x.shape[0]
    vmem_ceiling = _vmem_ceiling_bytes()
    param_bytes = sum(int(w.size) * w.dtype.itemsize for w in w_p)
    param_bytes += int(b_packed.size) * b_packed.dtype.itemsize
    if 2 * param_bytes > vmem_ceiling // 2:
        # TODO(synk): weight-streaming fallback (extra "arbitrary" grid axis over the
        # layers with per-step weight DMA) for hidden widths whose resident params
        # overflow VMEM (v7x's 64 MiB is hit first).
        raise ValueError("resident parameters exceed the VMEM budget; add a "
                         "weight-streaming path for this network size")

    # --- batch tile selection -------------------------------------------------
    bytes_per_row = (in_pad * cdt.itemsize
                     + out_pad * (mask_dt.itemsize + out_dtype.itemsize))
    b_round = _round_up(batch, _SUBLANE)
    tile_b = _round_up(max(_SUBLANE, min(tile_b, b_round)), _SUBLANE)
    # keep double-buffered streams + params within the VMEM ceiling
    stream_budget = max(vmem_ceiling - 2 * param_bytes - (4 << 20), 2 << 20)
    max_rows = max(_SUBLANE,
                   (stream_budget // (2 * bytes_per_row)) // _SUBLANE * _SUBLANE)
    tile_b = min(tile_b, max_rows)
    # v7x megacore: keep >=2 parallel grid steps while tiles stay >=256 rows;
    # on v5e/v6e the extra step costs ~0.35 us (negligible).
    if _cdiv(b_round, tile_b) < 2 and b_round >= 2 * 256:
        tile_b = _round_up(_cdiv(b_round, 2), _SUBLANE)
    b_pad = _round_up(batch, tile_b)
    grid = (b_pad // tile_b,)

    # --- streamed operands: cast / pad only when actually needed ---------------
    x = jnp.asarray(x)
    if x.dtype != cdt:
        x = x.astype(cdt)
    if (b_pad - batch) or (in_pad - in_dim):
        x = jnp.pad(x, ((0, b_pad - batch), (0, in_pad - in_dim)))

    mask = jnp.asarray(mask)
    mask = jnp.broadcast_to(mask, (batch, out_dim))   # PyTorch/NumPy broadcast rules
    if mask.dtype != mask_dt:
        mask = mask.astype(mask_dt)
    if (b_pad - batch) or (out_pad - out_dim):
        mask = jnp.pad(mask, ((0, b_pad - batch), (0, out_pad - out_dim)))

    cost = pl.CostEstimate(
        flops=int(2 * b_pad * sum(pads[l] * pads[l + 1] for l in range(num_layers))
                  + 2 * b_pad * out_pad),
        transcendentals=0,
        bytes_accessed=int(b_pad * bytes_per_row + param_bytes))

    def _param_spec(shape, nbuf):
        if nbuf == 1:   # resident operand: constant index map, single VMEM buffer
            return pl.BlockSpec(shape, lambda i: (0, 0), pipeline_mode=pl.Buffered(1))
        return pl.BlockSpec(shape, lambda i: (0, 0))

    def _call(nbuf):
        vmem_limit = int(min(vmem_ceiling,
                             2 * tile_b * bytes_per_row + nbuf * param_bytes + (4 << 20)))
        vmem_limit = max(vmem_limit, 8 << 20)
        in_specs = (
            [pl.BlockSpec((tile_b, in_pad), lambda i: (i, 0)),    # x: streamed
             pl.BlockSpec((tile_b, out_pad), lambda i: (i, 0))]   # mask: streamed
            + [_param_spec(w.shape, nbuf) for w in w_p]           # weights: resident
            + [_param_spec(b_packed.shape, nbuf)])                # bias table: resident
        return pl.pallas_call(
            functools.partial(_mlp_mask_kernel, num_layers, tuple(pads[1:])),
            out_shape=jax.ShapeDtypeStruct((b_pad, out_pad), out_dtype),
            grid=grid,
            in_specs=in_specs,
            out_specs=pl.BlockSpec((tile_b, out_pad), lambda i: (i, 0)),
            compiler_params=pltpu.CompilerParams(
                dimension_semantics=("parallel",),   # batch tiles -> 2nd TC on v7x
                vmem_limit_bytes=vmem_limit),
            cost_estimate=cost,
        )(x, mask, *w_p, b_packed)

    try:
        out = _call(1)                    # single-buffered resident parameters
    except Exception:                     # fallback if Buffered(1) is rejected
        out = _call(2)

    if b_pad == batch and out_pad == out_dim:
        return out
    return out[:batch, :out_dim]          # drop inert batch-row / feature-lane padding


def init_params(key, input_dim, output_dim, hidden_dims):
    """Deterministic PyTorch-style init: U(-1/sqrt(fan_in), 1/sqrt(fan_in))."""
    dims = [input_dim] + list(hidden_dims) + [output_dim]
    weights, biases = [], []
    for i in range(len(dims) - 1):
        fan_in, fan_out = dims[i], dims[i + 1]
        key, kw, kb = jax.random.split(key, 3)
        bound = 1.0 / (fan_in ** 0.5)
        weights.append(jax.random.uniform(kw, (fan_out, fan_in), jnp.float32,
                                          minval=-bound, maxval=bound))
        biases.append(jax.random.uniform(kb, (fan_out,), jnp.float32,
                                         minval=-bound, maxval=bound))
    return weights, biases


def reference_forward(x, mask, weights, biases):
    h = x
    for w, b in zip(weights, biases):
        h = jnp.maximum(h @ w.T + b, 0.0)   # ReLU after every Linear, incl. the last
    return h * mask


if __name__ == "__main__":
    key = jax.random.PRNGKey(0)

    batch = 512            # splits into 2 parallel 256-row tiles (megacore-friendly)
    input_dim = 32
    hidden_layers = [64, 48]
    output_dim = 16

    kx, km, kp = jax.random.split(key, 3)
    x = jax.random.normal(kx, (batch, input_dim), jnp.float32)
    mask = (jax.random.uniform(km, (batch, output_dim)) > 0.5).astype(jnp.float32)
    weights, biases = init_params(kp, input_dim, output_dim, hidden_layers)
    ref = reference_forward(x, mask, weights, biases)

    # f32 path (tight check everywhere).
    packed_f32 = pack_params(weights, biases, compute_dtype=jnp.float32)
    out = jax.block_until_ready(customized_nn_forward(x, mask, packed_f32))
    assert out.shape == (batch, output_dim)
    assert jnp.allclose(out, ref, atol=1e-5, rtol=1e-5), "f32 mismatch vs reference"

    # odd batch: exercises the row-padding / single-tile path.
    out_s = jax.block_until_ready(customized_nn_forward(x[:37], mask[:37], packed_f32))
    assert out_s.shape == (37, output_dim)
    assert jnp.allclose(out_s, ref[:37], atol=1e-5, rtol=1e-5), "odd-batch mismatch"

    # default bf16 path (bf16 x/weights/mask/out streams, f32 MXU accumulation).
    packed_bf16 = pack_params(weights, biases)          # compute_dtype defaults to bf16
    out_bf16 = jax.block_until_ready(
        customized_nn_forward(x, mask, packed_bf16, out_dtype=jnp.bfloat16))
    assert out_bf16.shape == (batch, output_dim)
    assert jnp.allclose(out_bf16.astype(jnp.float32), ref, atol=5e-2, rtol=5e-2), \
        "bf16 mismatch vs reference"

    print("KERNEL_OK")
</pallas_src>

<mosaic_0001>
module attributes {stable_mosaic.version = 11 : i64} {
  func.func @_mlp_mask_kernel(%arg0: i32, %arg1: memref<256x128xf32, #tpu.memory_space<vmem>>, %arg2: memref<256x128xf32, #tpu.memory_space<vmem>>, %arg3: memref<128x128xf32, #tpu.memory_space<vmem>>, %arg4: memref<128x128xf32, #tpu.memory_space<vmem>>, %arg5: memref<128x128xf32, #tpu.memory_space<vmem>>, %arg6: memref<3x128xf32, #tpu.memory_space<vmem>>, %arg7: memref<256x128xf32, #tpu.memory_space<vmem>>) attributes {dimension_semantics = [#tpu.dimension_semantics<parallel>], iteration_bounds = array<i64: 2>, scalar_prefetch = 0 : i64, scratch_operands = 0 : i64, tpu.core_type = #tpu.core_type<tc>, window_params = [{transform_indices = @transform_0, window_bounds = array<i64: 256, 128>}, {transform_indices = @transform_1, window_bounds = array<i64: 256, 128>}, {pipeline_mode = #tpu.pipeline_mode<synchronous>, transform_indices = @transform_2, window_bounds = array<i64: 128, 128>}, {pipeline_mode = #tpu.pipeline_mode<synchronous>, transform_indices = @transform_3, window_bounds = array<i64: 128, 128>}, {pipeline_mode = #tpu.pipeline_mode<synchronous>, transform_indices = @transform_4, window_bounds = array<i64: 128, 128>}, {pipeline_mode = #tpu.pipeline_mode<synchronous>, transform_indices = @transform_5, window_bounds = array<i64: 3, 128>}, {transform_indices = @transform_6, window_bounds = array<i64: 256, 128>}]} {
    %c0 = arith.constant 0 : index
    %c0_0 = arith.constant 0 : index
    %0 = vector.load %arg1[%c0, %c0_0] : memref<256x128xf32, #tpu.memory_space<vmem>>, vector<256x128xf32>
    %c0_1 = arith.constant 0 : index
    %c0_2 = arith.constant 0 : index
    %1 = vector.load %arg3[%c0_1, %c0_2] : memref<128x128xf32, #tpu.memory_space<vmem>>, vector<128x128xf32>
    %cst = arith.constant dense<0.000000e+00> : vector<256x128xf32>
    %2 = tpu.matmul %0, %1, %cst {dimension_numbers = #tpu.dot_dimension_numbers<[1], [1], [0], [0], [0, 0, 1, 0], [], []>} : vector<256x128xf32>, vector<128x128xf32>, vector<256x128xf32> -> vector<256x128xf32>
    %c0_3 = arith.constant 0 : index
    %c0_4 = arith.constant 0 : index
    %3 = vector.load %arg6[%c0_3, %c0_4] : memref<3x128xf32, #tpu.memory_space<vmem>>, vector<1x128xf32>
    %4 = vector.broadcast %3 : vector<1x128xf32> to vector<256x128xf32>
    %5 = arith.addf %2, %4 : vector<256x128xf32>
    %cst_5 = arith.constant 0.000000e+00 : f32
    %6 = vector.broadcast %cst_5 : f32 to vector<256x128xf32>
    %7 = arith.maximumf %5, %6 : vector<256x128xf32>
    %c0_6 = arith.constant 0 : index
    %c0_7 = arith.constant 0 : index
    %8 = vector.load %arg4[%c0_6, %c0_7] : memref<128x128xf32, #tpu.memory_space<vmem>>, vector<128x128xf32>
    %cst_8 = arith.constant dense<0.000000e+00> : vector<256x128xf32>
    %9 = tpu.matmul %7, %8, %cst_8 {dimension_numbers = #tpu.dot_dimension_numbers<[1], [1], [0], [0], [0, 0, 1, 0], [], []>} : vector<256x128xf32>, vector<128x128xf32>, vector<256x128xf32> -> vector<256x128xf32>
    %c1 = arith.constant 1 : index
    %c0_9 = arith.constant 0 : index
    %10 = vector.load %arg6[%c1, %c0_9] : memref<3x128xf32, #tpu.memory_space<vmem>>, vector<1x128xf32>
    %11 = vector.broadcast %10 : vector<1x128xf32> to vector<256x128xf32>
    %12 = arith.addf %9, %11 : vector<256x128xf32>
    %cst_10 = arith.constant 0.000000e+00 : f32
    %13 = vector.broadcast %cst_10 : f32 to vector<256x128xf32>
    %14 = arith.maximumf %12, %13 : vector<256x128xf32>
    %c0_11 = arith.constant 0 : index
    %c0_12 = arith.constant 0 : index
    %15 = vector.load %arg5[%c0_11, %c0_12] : memref<128x128xf32, #tpu.memory_space<vmem>>, vector<128x128xf32>
    %cst_13 = arith.constant dense<0.000000e+00> : vector<256x128xf32>
    %16 = tpu.matmul %14, %15, %cst_13 {dimension_numbers = #tpu.dot_dimension_numbers<[1], [1], [0], [0], [0, 0, 1, 0], [], []>} : vector<256x128xf32>, vector<128x128xf32>, vector<256x128xf32> -> vector<256x128xf32>
    %c2 = arith.constant 2 : index
    %c0_14 = arith.constant 0 : index
    %17 = vector.load %arg6[%c2, %c0_14] : memref<3x128xf32, #tpu.memory_space<vmem>>, vector<1x128xf32>
    %18 = vector.broadcast %17 : vector<1x128xf32> to vector<256x128xf32>
    %19 = arith.addf %16, %18 : vector<256x128xf32>
    %cst_15 = arith.constant 0.000000e+00 : f32
    %20 = vector.broadcast %cst_15 : f32 to vector<256x128xf32>
    %21 = arith.maximumf %19, %20 : vector<256x128xf32>
    %c0_16 = arith.constant 0 : index
    %c0_17 = arith.constant 0 : index
    %22 = vector.load %arg2[%c0_16, %c0_17] : memref<256x128xf32, #tpu.memory_space<vmem>>, vector<256x128xf32>
    %23 = arith.mulf %21, %22 : vector<256x128xf32>
    %c0_18 = arith.constant 0 : index
    %c0_19 = arith.constant 0 : index
    %24 = vector.load %arg7[%c0_18, %c0_19] : memref<256x128xf32, #tpu.memory_space<vmem>>, vector<256x128xf32>
    tpu.vector_store %arg7[%c0_18, %c0_19], %23 {strides = array<i32>} : memref<256x128xf32, #tpu.memory_space<vmem>>, vector<256x128xf32>,
    return
  }
  func.func @transform_0(%arg0: i32) -> (i32, i32) {
    %c0_i32 = arith.constant 0 : i32
    %c0_i32_0 = arith.constant 0 : i32
    return %arg0, %c0_i32 : i32, i32
  }
  func.func @transform_1(%arg0: i32) -> (i32, i32) {
    %c0_i32 = arith.constant 0 : i32
    %c0_i32_0 = arith.constant 0 : i32
    return %arg0, %c0_i32 : i32, i32
  }
  func.func @transform_2(%arg0: i32) -> (i32, i32) {
    %c0_i32 = arith.constant 0 : i32
    %c0_i32_0 = arith.constant 0 : i32
    %c0_i32_1 = arith.constant 0 : i32
    return %c0_i32, %c0_i32_0 : i32, i32
  }
  func.func @transform_3(%arg0: i32) -> (i32, i32) {
    %c0_i32 = arith.constant 0 : i32
    %c0_i32_0 = arith.constant 0 : i32
    %c0_i32_1 = arith.constant 0 : i32
    return %c0_i32, %c0_i32_0 : i32, i32
  }
  func.func @transform_4(%arg0: i32) -> (i32, i32) {
    %c0_i32 = arith.constant 0 : i32
    %c0_i32_0 = arith.constant 0 : i32
    %c0_i32_1 = arith.constant 0 : i32
    return %c0_i32, %c0_i32_0 : i32, i32
  }
  func.func @transform_5(%arg0: i32) -> (i32, i32) {
    %c0_i32 = arith.constant 0 : i32
    %c0_i32_0 = arith.constant 0 : i32
    %c0_i32_1 = arith.constant 0 : i32
    return %c0_i32, %c0_i32_0 : i32, i32
  }
  func.func @transform_6(%arg0: i32) -> (i32, i32) {
    %c0_i32 = arith.constant 0 : i32
    %c0_i32_0 = arith.constant 0 : i32
    return %arg0, %c0_i32 : i32, i32
  }
}

module attributes {stable_mosaic.version = 11 : i64} {
  func.func @_mlp_mask_kernel(%arg0: i32, %arg1: memref<256x128xf32, #tpu.memory_space<vmem>>, %arg2: memref<256x128xf32, #tpu.memory_space<vmem>>, %arg3: memref<128x128xf32, #tpu.memory_space<vmem>>, %arg4: memref<128x128xf32, #tpu.memory_space<vmem>>, %arg5: memref<128x128xf32, #tpu.memory_space<vmem>>, %arg6: memref<3x128xf32, #tpu.memory_space<vmem>>, %arg7: memref<256x128xf32, #tpu.memory_space<vmem>>) attributes {dimension_semantics = [#tpu.dimension_semantics<parallel>], iteration_bounds = array<i64: 2>, scalar_prefetch = 0 : i64, scratch_operands = 0 : i64, tpu.core_type = #tpu.core_type<tc>, window_params = [{transform_indices = @transform_0, window_bounds = array<i64: 256, 128>}, {transform_indices = @transform_1, window_bounds = array<i64: 256, 128>}, {pipeline_mode = #tpu.pipeline_mode<synchronous>, transform_indices = @transform_2, window_bounds = array<i64: 128, 128>}, {pipeline_mode = #tpu.pipeline_mode<synchronous>, transform_indices = @transform_3, window_bounds = array<i64: 128, 128>}, {pipeline_mode = #tpu.pipeline_mode<synchronous>, transform_indices = @transform_4, window_bounds = array<i64: 128, 128>}, {pipeline_mode = #tpu.pipeline_mode<synchronous>, transform_indices = @transform_5, window_bounds = array<i64: 3, 128>}, {transform_indices = @transform_6, window_bounds = array<i64: 256, 128>}]} {
    %c0 = arith.constant 0 : index
    %c0_0 = arith.constant 0 : index
    %0 = vector.load %arg1[%c0, %c0_0] : memref<256x128xf32, #tpu.memory_space<vmem>>, vector<256x128xf32>
    %c0_1 = arith.constant 0 : index
    %c0_2 = arith.constant 0 : index
    %1 = vector.load %arg3[%c0_1, %c0_2] : memref<128x128xf32, #tpu.memory_space<vmem>>, vector<128x128xf32>
    %cst = arith.constant dense<0.000000e+00> : vector<256x128xf32>
    %2 = tpu.matmul %0, %1, %cst {dimension_numbers = #tpu.dot_dimension_numbers<[1], [1], [0], [0], [0, 0, 1, 0], [], []>} : vector<256x128xf32>, vector<128x128xf32>, vector<256x128xf32> -> vector<256x128xf32>
    %c0_3 = arith.constant 0 : index
    %c0_4 = arith.constant 0 : index
    %3 = vector.load %arg6[%c0_3, %c0_4] : memref<3x128xf32, #tpu.memory_space<vmem>>, vector<1x128xf32>
    %4 = vector.broadcast %3 : vector<1x128xf32> to vector<256x128xf32>
    %5 = arith.addf %2, %4 : vector<256x128xf32>
    %cst_5 = arith.constant 0.000000e+00 : f32
    %6 = vector.broadcast %cst_5 : f32 to vector<256x128xf32>
    %7 = arith.maximumf %5, %6 : vector<256x128xf32>
    %c0_6 = arith.constant 0 : index
    %c0_7 = arith.constant 0 : index
    %8 = vector.load %arg4[%c0_6, %c0_7] : memref<128x128xf32, #tpu.memory_space<vmem>>, vector<128x128xf32>
    %cst_8 = arith.constant dense<0.000000e+00> : vector<256x128xf32>
    %9 = tpu.matmul %7, %8, %cst_8 {dimension_numbers = #tpu.dot_dimension_numbers<[1], [1], [0], [0], [0, 0, 1, 0], [], []>} : vector<256x128xf32>, vector<128x128xf32>, vector<256x128xf32> -> vector<256x128xf32>
    %c1 = arith.constant 1 : index
    %c0_9 = arith.constant 0 : index
    %10 = vector.load %arg6[%c1, %c0_9] : memref<3x128xf32, #tpu.memory_space<vmem>>, vector<1x128xf32>
    %11 = vector.broadcast %10 : vector<1x128xf32> to vector<256x128xf32>
    %12 = arith.addf %9, %11 : vector<256x128xf32>
    %cst_10 = arith.constant 0.000000e+00 : f32
    %13 = vector.broadcast %cst_10 : f32 to vector<256x128xf32>
    %14 = arith.maximumf %12, %13 : vector<256x128xf32>
    %c0_11 = arith.constant 0 : index
    %c0_12 = arith.constant 0 : index
    %15 = vector.load %arg5[%c0_11, %c0_12] : memref<128x128xf32, #tpu.memory_space<vmem>>, vector<128x128xf32>
    %cst_13 = arith.constant dense<0.000000e+00> : vector<256x128xf32>
    %16 = tpu.matmul %14, %15, %cst_13 {dimension_numbers = #tpu.dot_dimension_numbers<[1], [1], [0], [0], [0, 0, 1, 0], [], []>} : vector<256x128xf32>, vector<128x128xf32>, vector<256x128xf32> -> vector<256x128xf32>
    %c2 = arith.constant 2 : index
    %c0_14 = arith.constant 0 : index
    %17 = vector.load %arg6[%c2, %c0_14] : memref<3x128xf32, #tpu.memory_space<vmem>>, vector<1x128xf32>
    %18 = vector.broadcast %17 : vector<1x128xf32> to vector<256x128xf32>
    %19 = arith.addf %16, %18 : vector<256x128xf32>
    %cst_15 = arith.constant 0.000000e+00 : f32
    %20 = vector.broadcast %cst_15 : f32 to vector<256x128xf32>
    %21 = arith.maximumf %19, %20 : vector<256x128xf32>
    %c0_16 = arith.constant 0 : index
    %c0_17 = arith.constant 0 : index
    %22 = vector.load %arg2[%c0_16, %c0_17] : memref<256x128xf32, #tpu.memory_space<vmem>>, vector<256x128xf32>
    %23 = arith.mulf %21, %22 : vector<256x128xf32>
    %c0_18 = arith.constant 0 : index
    %c0_19 = arith.constant 0 : index
    %24 = vector.load %arg7[%c0_18, %c0_19] : memref<256x128xf32, #tpu.memory_space<vmem>>, vector<256x128xf32>
    tpu.vector_store %arg7[%c0_18, %c0_19], %23 {strides = array<i32>} : memref<256x128xf32, #tpu.memory_space<vmem>>, vector<256x128xf32>,
    return
  }
  func.func @transform_0(%arg0: i32) -> (i32, i32) {
    %c0_i32 = arith.constant 0 : i32
    %c0_i32_0 = arith.constant 0 : i32
    return %arg0, %c0_i32 : i32, i32
  }
  func.func @transform_1(%arg0: i32) -> (i32, i32) {
    %c0_i32 = arith.constant 0 : i32
    %c0_i32_0 = arith.constant 0 : i32
    return %arg0, %c0_i32 : i32, i32
  }
  func.func @transform_2(%arg0: i32) -> (i32, i32) {
    %c0_i32 = arith.constant 0 : i32
    %c0_i32_0 = arith.constant 0 : i32
    %c0_i32_1 = arith.constant 0 : i32
    return %c0_i32, %c0_i32_0 : i32, i32
  }
  func.func @transform_3(%arg0: i32) -> (i32, i32) {
    %c0_i32 = arith.constant 0 : i32
    %c0_i32_0 = arith.constant 0 : i32
    %c0_i32_1 = arith.constant 0 : i32
    return %c0_i32, %c0_i32_0 : i32, i32
  }
  func.func @transform_4(%arg0: i32) -> (i32, i32) {
    %c0_i32 = arith.constant 0 : i32
    %c0_i32_0 = arith.constant 0 : i32
    %c0_i32_1 = arith.constant 0 : i32
    return %c0_i32, %c0_i32_0 : i32, i32
  }
  func.func @transform_5(%arg0: i32) -> (i32, i32) {
    %c0_i32 = arith.constant 0 : i32
    %c0_i32_0 = arith.constant 0 : i32
    %c0_i32_1 = arith.constant 0 : i32
    return %c0_i32, %c0_i32_0 : i32, i32
  }
  func.func @transform_6(%arg0: i32) -> (i32, i32) {
    %c0_i32 = arith.constant 0 : i32
    %c0_i32_0 = arith.constant 0 : i32
    return %arg0, %c0_i32 : i32, i32
  }
}

</mosaic_0001>

<bundles_post_ra>
// kernel: tpu_custom_call.1
= control target key start
LH: loop header
LB: loop body
LE: loop exit
PB: predicated region body
PF: predicated region fallthrough
CT: control target
= control target key end

     0   :  { %s2802_s0 = inlined_call_operand.hbm [shape: f32[512,128], index: 0, kind: input, shape index: {}]   ;;  %s2803_s1 = inlined_call_operand.hbm [shape: f32[512,128], index: 1, kind: input, shape index: {}]   ;;  %s2804_s2 = inlined_call_operand.hbm [shape: f32[128,128], index: 2, kind: input, shape index: {}]   ;;  %s2805_s3 = inlined_call_operand.hbm [shape: f32[128,128], index: 3, kind: input, shape index: {}]   ;;  %s2806_s4 = inlined_call_operand.hbm [shape: f32[128,128], index: 4, kind: input, shape index: {}]   ;;  %s2807_s5 = inlined_call_operand.vmem [shape: f32[3,128], index: 5, kind: input, shape index: {}]   ;;  %s2808_s6 = inlined_call_operand.hbm [shape: f32[512,128], index: 6, kind: output, shape index: {}]  }
   0x1   :  { %2816 = sst [smem:[#allocation18_spill]] %s2802_s0 }
   0x2   :  { %2817 = sst [smem:[#allocation19_spill]] %s2804_s2 }
   0x3   :  { %2818 = sst [smem:[#allocation20_spill]] %s2805_s3 }
   0x4   :  { %2819 = sst [smem:[#allocation21_spill]] %s2806_s4 }
   0x5   :  { %11 = vsyncpa [#allocation3], 0 }
   0x6   :  { %13 = vsyncpa [#allocation3 + $0x1], 0 }
   0x7   :  { %14 = vsyncpa [#allocation6], 0 }
   0x8   :  { %16 = vsyncpa [#allocation6 + $0x1], 0 }
   0x9   :  { %17 = vsyncpa [#allocation9], 0 }
   0xa   :  { %18 = vsyncpa [#allocation4], 0 }
   0xb   :  { %20 = vsyncpa [#allocation4 + $0x1], 0  ;;  %s2245_s21 = smov 0   ;;  %s2247_s22 = smov 0  }
   0xc   :  { %s2249_s23 = smov 0   ;;  %s2251_s24 = smov 0  }
   0xd LB: > { %s2266_s25 = sadd.s32 4294967295, %s2198_s24   ;;  %s1456_s26 = sadd.s32 4294967294, %s2198_s24   ;;  %s2198_s24 = sphi %s2251_s24, %s2845_s24   ;;  %s2194_s23 = sphi %s2249_s23, %s2844_s23   ;;  %s2190_s22 = sphi %s2247_s22, %s2843_s22   ;;  %s2186_s21 = sphi %s2245_s21, %s2842_s21  }
   0xe   : > { %p46_p0 = scmp.ne.s32.totalorder %s2190_s22, %s2186_s21  ;;  %p2809_p1 = scmp.eq.s32.totalorder %s2266_s25, 0 }
   0xf   : > { %p180_p2 = scmp.eq.s32.totalorder %s2266_s25, 1  ;;  %p186_p3 = scmp.eq.s32.totalorder %s1456_s26, 1 }
  0x10   : > { %p2275_p4 = por %p2809_p1, %p46_p0  ;;  %p1457_p5 = scmp.ge.s32.totalorder %s2198_s24, 1 }
  0x11   : > { %p2280_p6 = por %p186_p3, %p46_p0  ;;  %p193_p7 = scmp.lt.s32.totalorder %s2198_s24, 3 }
  0x12   : > { %s2820_s27 = scalar_select %p2275_p4, 1, 0 }
  0x13   : > { %s2821_s28 = scalar_select %p2280_p6, 1, 0 }
  0x14   : > { %p2285_p8 = pnand %p1457_p5, %p193_p7  ;;  %s2200_s30 = smov [#allocation7]  }
  0x15   : > { %s205_s7 = sshll.u32 %s2200_s30, 4  ;;  %s2201_s9 = smov [#allocation8]   ;;  %s206_s7 = int_to_ptr.vmem [resolvable:$true] %s205_s7 }
  0x16   : > { %p1920_p9 = pneg %p2285_p8  ;;  %s218_s10 = sshll.u32 %s2201_s9, 4  ;;  %s219_s10 = int_to_ptr.vmem [resolvable:$true] %s218_s10 }
  0x17   : > { %s2202_s11 = smov [#allocation10]   ;;  %s1999_s13 = scalar_lea.vmem %s206_s7, 2048 }
  0x18   : > { %p2294_p11 = pnand %p1920_p9, %p2809_p1  ;;  %s231_s12 = sshll.u32 %s2202_s11, 4  ;;  %s232_s12 = int_to_ptr.vmem [resolvable:$true] %s231_s12 }
  0x19   : > { %p2000_p13 = scmp.ne.s32.totalorder %s206_s7, %s1999_s13  ;;  %p2007_p5 = scmp.lt.s32.totalorder %s206_s7, %s206_s7 }
  0x1a   : > { %p1990_p12 = pneg %p2294_p11  ;;  %p2008_p7 = scmp.lt.s32.totalorder %s1999_s13, %s1999_s13 }
  0x1c   : > { %p2002_p0 = pnand %p2000_p13, %p1990_p12  ;;  %p2009_p9 = por %p2008_p7, %p2007_p5 }
  0x1e   : > { %p2003_p3 = pneg %p2002_p0 }
  0x20   : > { %p2010_p10 = pnand %p2009_p9, %p2003_p3 }
  0x22   : > { %2013 = shalt.err (!%p2010_p10)
}
  0x23   : > { %s2810_s14 = smov 128   ;;  %s2812_s15 = smov 8  }
  0x24   : > { %s2824_s2 = sld [smem:[#allocation19_spill]]  ;;  %s2025_s18 = scalar_lea.vmem %s219_s10, 2048 }
  0x25   : > { %p2026_p13 = scmp.ne.s32.totalorder %s219_s10, %s2025_s18  ;;  %p2033_p3 = scmp.lt.s32.totalorder %s219_s10, %s219_s10 }
  0x26   : > { %p2034_p10 = scmp.lt.s32.totalorder %s2025_s18, %s2025_s18 }
  0x27   : > { %p2028_p0 = pnand %p2026_p13, %p1990_p12 }
  0x28   : > { %p2035_p7 = por %p2034_p10, %p2033_p3 }
  0x29   : > { %p2029_p5 = pneg %p2028_p0 }
  0x2a   : > { %1923 = dma.hbm_to_vmem [thread:$0]  (!%p2294_p11), %s2824_s2, 2048, %s206_s7, [#allocation6], %s2810_s14, %s2810_s14, %s2812_s15  }
  0x2b   : > { %p2036_p9 = pnand %p2035_p7, %p2029_p5 }
  0x2d   : > { %2039 = shalt.err (!%p2036_p9)
}
  0x2e   : > { %s2825_s3 = sld [smem:[#allocation20_spill]]  ;;  %s2051_s26 = scalar_lea.vmem %s232_s12, 2048 }
  0x2f   : > { %p2052_p1 = scmp.ne.s32.totalorder %s232_s12, %s2051_s26  ;;  %p2059_p3 = scmp.lt.s32.totalorder %s232_s12, %s232_s12 }
  0x30   : > { %p2060_p5 = scmp.lt.s32.totalorder %s2051_s26, %s2051_s26 }
  0x31   : > { %p2054_p13 = pnand %p2052_p1, %p1990_p12 }
  0x32   : > { %p2061_p10 = por %p2060_p5, %p2059_p3 }
  0x33   : > { %p2055_p0 = pneg %p2054_p13 }
  0x34   : > { %1926 = dma.hbm_to_vmem [thread:$0]  (!%p2294_p11), %s2825_s3, 2048, %s219_s10, [#allocation9], %s2810_s14, %s2810_s14, %s2812_s15  }
  0x35   : > { %p2062_p7 = pnand %p2061_p10, %p2055_p0 }
  0x37   : > { %2065 = shalt.err (!%p2062_p7)
}
  0x38   : > { %s2826_s4 = sld [smem:[#allocation21_spill]]  ;;  %s2334_s9 = sadd.s32 1, %s2198_s24  }
  0x39   : > { %s30_s8 = ssub.s32 %s2198_s24, %s2334_s9  ;;  %s33_s10 = sadd.s32 1, %s2194_s23 }
  0x3a   : > { %p31_p1 = scmp.eq.s32.totalorder %s30_s8, 0  ;;  %p40_p12 = scmp.ne.s32.totalorder %s2194_s23, %s2190_s22 }
  0x3b   : > { %p41_p9 = scmp.eq.s32.totalorder %s2198_s24, 0  ;;  %p1944_p13 = scmp.lt.s32.totalorder %s2198_s24, 2 }
  0x3c   : > { %s2344_s11 = scalar_select %p31_p1, %s2194_s23, %s33_s10  }
  0x3d   : > { %p42_p0 = por %p41_p9, %p40_p12  ;;  %p2348_p3 = por %p180_p2, %p40_p12 }
  0x3e   : > { %1929 = dma.hbm_to_vmem [thread:$0]  (!%p2294_p11), %s2826_s4, 2048, %s232_s12, [#allocation9], %s2810_s14, %s2810_s14, %s2812_s15  }
  0x3f   : > { %2827 = sst [smem:[#allocation17_spill]] %s2344_s11  ;;  %s248_s16 = sand.u32 1, %s2194_s23  }
  0x40   : > { %s2828_s13 = scalar_select %p2348_p3, 1, 0 }
  0x41   : > { %s1483_s17 = sshll.u32 %s2198_s24, 12  ;;  %s2354_s12 = sshll.u32 %s248_s16, 8 }
  0x42   : > { %s2829_s0 = sld [smem:[#allocation18_spill]]  ;;  %s252_s26 = scalar_lea.vmem [#allocation2], %s2354_s12 }
  0x43   : > { %s259_s30 = sshll.u32 %s252_s26, 4  ;;  %p2362_p11 = pnand %p1944_p13, %p42_p0  ;;  %s2366_s30 = int_to_ptr.vmem [resolvable:$true] %s259_s30 }
  0x44   : > { %s2371_s18 = scalar_lea.hbm %s2803_s1, %s1483_s17  ;;  %s2373_s19 = scalar_lea.sflag [#allocation3], %s248_s16 }
  0x45   : > { %p2068_p5 = pneg %p2362_p11 }
  0x48   : > { %s2359_s20 = scalar_lea.hbm %s2829_s0, %s1483_s17  ;;  %s2071_s2 = scalar_lea.hbm %s2829_s0, 8192 }
  0x49   : > { %s2066_s14 = scalar_lea.hbm %s2359_s20, 4096  ;;  %p2072_p1 = scmp.lt.s32.totalorder %s2359_s20, %s2829_s0 }
  0x4a   : > { %p2067_p2 = scmp.ne.s32.totalorder %s2359_s20, %s2066_s14  ;;  %p2073_p12 = scmp.lt.s32.totalorder %s2071_s2, %s2066_s14 }
  0x4c   : > { %p2069_p10 = pnand %p2068_p5, %p2067_p2  ;;  %p2074_p9 = por %p2073_p12, %p2072_p1 }
  0x4e   : > { %p2070_p7 = pneg %p2069_p10 }
  0x50   : > { %p2075_p13 = pnand %p2074_p9, %p2070_p7 }
  0x52   : > { %2078 = shalt.err (!%p2075_p13)
}
  0x53   : > { %s2079_s16 = scalar_lea.vmem %s2366_s30, 4096  ;;  %s2205_s15 = smov [#allocation2]  }
  0x54   : > { %p2080_p0 = scmp.ne.s32.totalorder %s2366_s30, %s2079_s16  ;;  %s2084_s17 = sshll.u32 %s2205_s15, 4  ;;  %s2085_s17 = int_to_ptr.vmem [resolvable:$false] %s2084_s17 }
  0x55   : > { %s2086_s8 = scalar_lea.vmem %s2085_s17, 8192  ;;  %p2087_p6 = scmp.lt.s32.totalorder %s2366_s30, %s2085_s17 }
  0x56   : > { %p2082_p2 = pnand %p2080_p0, %p2068_p5  ;;  %p2088_p3 = scmp.lt.s32.totalorder %s2086_s8, %s2079_s16 }
  0x58   : > { %p2083_p10 = pneg %p2082_p2  ;;  %p2089_p4 = por %p2088_p3, %p2087_p6 }
  0x5a   : > { %p2090_p1 = pnand %p2089_p4, %p2083_p10 }
  0x5c   : > { %2093 = shalt.err (!%p2090_p1)
}
  0x5d   : > { %s2831_s2 = smov 8   ;;  %s2832_s3 = smov 128  }
  0x5e   : > { %1933 = dma.hbm_to_vmem [thread:$0]  (!%p2362_p11), %s2359_s20, 4096, %s2366_s30, %s2373_s19, %s2832_s3, %s2832_s3, %s2831_s2  }
  0x5f   : > { %s273_s4 = scalar_lea.vmem [#allocation5], %s2354_s12  ;;  %s269_s10 = sand.u32 1, %s2198_s24  }
  0x60   : > { %s280_s14 = sshll.u32 %s273_s4, 4  ;;  %s270_s26 = scalar_lea.sflag [#allocation6], %s269_s10  ;;  %s2405_s14 = int_to_ptr.vmem [resolvable:$true] %s280_s14 }
  0x61   : > { %s2094_s16 = scalar_lea.hbm %s2371_s18, 4096  ;;  %s2099_s8 = scalar_lea.hbm %s2803_s1, 8192 }
  0x62   : > { %p2095_p4 = scmp.ne.s32.totalorder %s2371_s18, %s2094_s16  ;;  %p2100_p7 = scmp.lt.s32.totalorder %s2371_s18, %s2803_s1 }
  0x63   : > { %p2101_p12 = scmp.lt.s32.totalorder %s2099_s8, %s2094_s16 }
  0x64   : > { %p2097_p6 = pnand %p2095_p4, %p2068_p5 }
  0x65   : > { %p2102_p9 = por %p2101_p12, %p2100_p7 }
  0x66   : > { %p2098_p3 = pneg %p2097_p6 }
  0x68   : > { %p2103_p13 = pnand %p2102_p9, %p2098_p3 }
  0x6a   : > { %2106 = shalt.err (!%p2103_p13)
}
  0x6b   : > { %s2107_s12 = scalar_lea.vmem %s2405_s14, 4096  ;;  %s2206_s20 = smov [#allocation5]  }
  0x6c   : > { %p2108_p0 = scmp.ne.s32.totalorder %s2405_s14, %s2107_s12  ;;  %s2112_s30 = sshll.u32 %s2206_s20, 4  ;;  %s2113_s30 = int_to_ptr.vmem [resolvable:$false] %s2112_s30 }
  0x6d   : > { %s2114_s19 = scalar_lea.vmem %s2113_s30, 8192  ;;  %p2115_p1 = scmp.lt.s32.totalorder %s2405_s14, %s2113_s30 }
  0x6e   : > { %p2110_p2 = pnand %p2108_p0, %p2068_p5  ;;  %p2116_p4 = scmp.lt.s32.totalorder %s2114_s19, %s2107_s12 }
  0x70   : > { %p2111_p10 = pneg %p2110_p2  ;;  %p2117_p6 = por %p2116_p4, %p2115_p1 }
  0x72   : > { %p2118_p7 = pnand %p2117_p6, %p2111_p10 }
  0x74   : > { %2121 = shalt.err (!%p2118_p7)
}
  0x75   : > { %1936 = dma.hbm_to_vmem [thread:$0]  (!%p2362_p11), %s2371_s18, 4096, %s2405_s14, %s270_s26, %s2832_s3, %s2832_s3, %s2831_s2  }
  0x76   : > { %292 = sbr.rel (%p2285_p8) target bundleno = 873 (0x369), region = 44  ;;  %s2435_s0 = sand.u32 (!%p2285_p8), 1, %s2190_s22  }
  0x77   : > { %s2438_s11 = sshll.u32 (!%p2285_p8), %s2435_s0, 8  ;;  %s295_s4 = scalar_lea.sflag (!%p2285_p8), [#allocation3], %s2435_s0 }
  0x78   : > { %s2442_s7 = scalar_lea.vmem (!%p2285_p8), [#allocation2], %s2438_s11  ;;  %p2833_p5 = scmp.ne.s32.totalorder (!%p2285_p8), %s2820_s27, 0 }
  0x7b   : > { %2165 = dma.done.wait (%p2833_p5), %s295_s4, 4096  }
  0x7c   : > { %2167 = vsyncadd (%p2833_p5), %s295_s4, 4294963200  ;;  %s303_s29 = sand.u32 1, %s2266_s25   ;;  %s2450_s2 = scalar_lea.vmem [#allocation5], %s2438_s11 }
  0x7d   : > { %s304_s18 = scalar_lea.sflag [#allocation6], %s303_s29 }
  0x7e   : > { %2169 = dma.done.wait (%p2833_p5), %s304_s18, 4096  }
  0x7f   : > { %2171 = vsyncadd (%p2833_p5), %s304_s18, 4294963200  ;;  %p2834_p8 = scmp.eq.s32.totalorder %s2266_s25, 0 }
  0x81   : > { %2173 = dma.done.wait (%p2834_p8), [#allocation6], 2048   ;;  %p2835_p11 = pmov %p2834_p8 }
  0x82   : > { %p2836_p3 = pmov %p2834_p8 }
  0x83   : > { %2175 = vsyncadd (%p2835_p11), [#allocation6], 4294965248 }
  0x84   : > { %2177 = dma.done.wait (%p2836_p3), [#allocation9], 4096   ;;  %p2837_p12 = pmov %p2836_p3 }
  0x85   : > { %v403_v0 = vld [vmem:[#allocation7 + $0x78] sm:$0xff]  ;;  %v402_v1 = vld [vmem:[#allocation7 + $0x70] sm:$0xff]  ;;  %v401_v2 = vld [vmem:[#allocation7 + $0x68] sm:$0xff]  ;;  %s2660_s15 = scalar_lea.vmem [#allocation11], %s2438_s11  ;;  %s1485_s17 = sshll.u32 %s2266_s25, 12 }
  0x86   : > { %2179 = vsyncadd (%p2837_p12), [#allocation9], 4294963200  ;;  %1630 = vmatprep.subr.mxu0 %v403_v0  ;;  %v356_v3 = vld [vmem:[%s2442_s7] sm:$0xff]  ;;  %v399_v5 = vld [vmem:[#allocation7 + $0x58] sm:$0xff]  ;;  %s1332_s8 = sshll.u32 %s2660_s15, 4  ;;  %s2755_s30 = scalar_lea.hbm %s2808_s6, %s1485_s17  ;;  %s2757_s8 = int_to_ptr.vmem [resolvable:$true] %s1332_s8 }
  0x87   : > { %1631 = vmatpush3.xpose.msra.mxu0 %v403_v0  ;;  %1662 = vmatprep.mubr.f32.mxu0 %v356_v3  ;;  %v400_v4 = vld [vmem:[#allocation7 + $0x60] sm:$0xff]  ;;  %v398_v6 = vld [vmem:[#allocation7 + $0x50] sm:$0xff]  ;;  %v681_v7 = vld [vmem:[#allocation8 + $0x78] sm:$0xff]  ;;  %s1319_s19 = scalar_lea.sflag [#allocation4], %s2435_s0  ;;  %s2122_s25 = scalar_lea.vmem %s2757_s8, 4096 }
  0x88   : > { %1632 = vmatprep.subr.mxu0 %v402_v1  ;;  %v680_v8 = vld [vmem:[#allocation8 + $0x70] sm:$0xff]  ;;  %1710 = vmatprep.subr.mxu1 %v681_v7  ;;  %v397_v9 = vld [vmem:[#allocation7 + $0x48] sm:$0xff]  ;;  %v396_v11 = vld [vmem:[#allocation7 + $0x40] sm:$0xff]  ;;  %p2123_p9 = scmp.ne.s32.totalorder %s2757_s8, %s2122_s25  ;;  %p2838_p13 = scmp.ne.s32.totalorder %s2828_s13, 0 }
  0x89   : > { %1711 = vmatpush3.xpose.msra.mxu1 %v681_v7  ;;  %v679_v10 = vld [vmem:[#allocation8 + $0x68] sm:$0xff]  ;;  %v678_v12 = vld [vmem:[#allocation8 + $0x60] sm:$0xff]  ;;  %v395_v13 = vld [vmem:[#allocation7 + $0x38] sm:$0xff]  ;;  %s2207_s11 = smov [#allocation11]  }
  0x8a   : > { %1712 = vmatprep.subr.mxu1 %v680_v8  ;;  %v677_v14 = vld [vmem:[#allocation8 + $0x58] sm:$0xff]  ;;  %v394_v15 = vld [vmem:[#allocation7 + $0x30] sm:$0xff]  ;;  %v393_v17 = vld [vmem:[#allocation7 + $0x28] sm:$0xff]  ;;  %p2124_p0 = pnand %p2123_p9, %p2838_p13  ;;  %s2126_s4 = sshll.u32 %s2207_s11, 4  ;;  %s2127_s4 = int_to_ptr.vmem [resolvable:$false] %s2126_s4 }
  0x8b   : > { %1633 = vmatpush3.xpose.msra.mxu0 %v402_v1  ;;  %v676_v16 = vld [vmem:[#allocation8 + $0x50] sm:$0xff]  ;;  %v675_v18 = vld [vmem:[#allocation8 + $0x48] sm:$0xff]  ;;  %v392_v19 = vld [vmem:[#allocation7 + $0x20] sm:$0xff]  ;;  %p2129_p10 = scmp.lt.s32.totalorder %s2757_s8, %s2127_s4 }
  0x8c   : > { %1634 = vmatprep.subr.mxu0 %v401_v2  ;;  %v674_v20 = vld [vmem:[#allocation8 + $0x40] sm:$0xff]  ;;  %v391_v21 = vld [vmem:[#allocation7 + $0x18] sm:$0xff]  ;;  %v390_v23 = vld [vmem:[#allocation7 + $0x10] sm:$0xff]  ;;  %p2125_p2 = pneg %p2124_p0 }
  0x8d   : > { %1713 = vmatpush3.xpose.msra.mxu1 %v680_v8  ;;  %v673_v22 = vld [vmem:[#allocation8 + $0x38] sm:$0xff]  ;;  %v672_v24 = vld [vmem:[#allocation8 + $0x30] sm:$0xff]  ;;  %v389_v25 = vld [vmem:[#allocation7 + $0x8] sm:$0xff] }
  0x8e   : > { %1714 = vmatprep.subr.mxu1 %v679_v10  ;;  %v671_v26 = vld [vmem:[#allocation8 + $0x28] sm:$0xff]  ;;  %v388_v27 = vld [vmem:[#allocation7] sm:$0xff]  ;;  %v669_v29 = vld [vmem:[#allocation8 + $0x18] sm:$0xff] }
  0x8f   : > { %1635 = vmatpush3.xpose.msra.mxu0 %v401_v2  ;;  %v670_v28 = vld [vmem:[#allocation8 + $0x20] sm:$0xff]  ;;  %v357_v30 = vld [vmem:[%s2442_s7 + $0x8] sm:$0xff]  ;;  %v358_v31 = vld [vmem:[%s2442_s7 + $0x10] sm:$0xff] }
  0x90   : > { %1636 = vmatprep.subr.mxu0 %v400_v4  ;;  %v668_v32 = vld [vmem:[#allocation8 + $0x10] sm:$0xff]  ;;  %v359_v33 = vld [vmem:[%s2442_s7 + $0x18] sm:$0xff]  ;;  %v360_v34 = vld [vmem:[%s2442_s7 + $0x20] sm:$0xff] }
  0x91   : > { %1715 = vmatpush3.xpose.msra.mxu1 %v679_v10  ;;  %v361_v35 = vld [vmem:[%s2442_s7 + $0x28] sm:$0xff]  ;;  %v362_v36 = vld [vmem:[%s2442_s7 + $0x30] sm:$0xff]  ;;  %v363_v37 = vld [vmem:[%s2442_s7 + $0x38] sm:$0xff] }
  0x92   : > { %1716 = vmatprep.subr.mxu1 %v678_v12  ;;  %v364_v38 = vld [vmem:[%s2442_s7 + $0x40] sm:$0xff]  ;;  %v365_v39 = vld [vmem:[%s2442_s7 + $0x48] sm:$0xff]  ;;  %v366_v40 = vld [vmem:[%s2442_s7 + $0x50] sm:$0xff] }
  0x93   : > { %1637 = vmatpush3.xpose.msra.mxu0 %v400_v4  ;;  %v367_v41 = vld [vmem:[%s2442_s7 + $0x58] sm:$0xff]  ;;  %v368_v42 = vld [vmem:[%s2442_s7 + $0x60] sm:$0xff]  ;;  %v369_v43 = vld [vmem:[%s2442_s7 + $0x68] sm:$0xff] }
  0x94   : > { %1638 = vmatprep.subr.mxu0 %v399_v5  ;;  %v370_v44 = vld [vmem:[%s2442_s7 + $0x70] sm:$0xff]  ;;  %v371_v45 = vld [vmem:[%s2442_s7 + $0x78] sm:$0xff]  ;;  %v372_v46 = vld [vmem:[%s2442_s7 + $0x80] sm:$0xff] }
  0x95   : > { %1717 = vmatpush3.xpose.msra.mxu1 %v678_v12  ;;  %v373_v47 = vld [vmem:[%s2442_s7 + $0x88] sm:$0xff]  ;;  %v374_v48 = vld [vmem:[%s2442_s7 + $0x90] sm:$0xff]  ;;  %v375_v49 = vld [vmem:[%s2442_s7 + $0x98] sm:$0xff] }
  0x96   : > { %1718 = vmatprep.subr.mxu1 %v677_v14  ;;  %v376_v50 = vld [vmem:[%s2442_s7 + $0xa0] sm:$0xff]  ;;  %v377_v51 = vld [vmem:[%s2442_s7 + $0xa8] sm:$0xff]  ;;  %v378_v52 = vld [vmem:[%s2442_s7 + $0xb0] sm:$0xff] }
  0x97   : > { %1639 = vmatpush3.xpose.msra.mxu0 %v399_v5  ;;  %v379_v53 = vld [vmem:[%s2442_s7 + $0xb8] sm:$0xff]  ;;  %v380_v54 = vld [vmem:[%s2442_s7 + $0xc0] sm:$0xff]  ;;  %v381_v55 = vld [vmem:[%s2442_s7 + $0xc8] sm:$0xff] }
  0x98   : > { %1640 = vmatprep.subr.mxu0 %v398_v6  ;;  %v382_v56 = vld [vmem:[%s2442_s7 + $0xd0] sm:$0xff]  ;;  %v383_v57 = vld [vmem:[%s2442_s7 + $0xd8] sm:$0xff]  ;;  %v384_v58 = vld [vmem:[%s2442_s7 + $0xe0] sm:$0xff] }
  0x99   : > { %1719 = vmatpush3.xpose.msra.mxu1 %v677_v14  ;;  %v385_v59 = vld [vmem:[%s2442_s7 + $0xe8] sm:$0xff]  ;;  %v386_v60 = vld [vmem:[%s2442_s7 + $0xf0] sm:$0xff]  ;;  %v387_v61 = vld [vmem:[%s2442_s7 + $0xf8] sm:$0xff]  ;;  %s2128_s7 = scalar_lea.vmem %s2127_s4, 8192 }
  0x9a   : > { %1720 = vmatprep.subr.mxu1 %v676_v16  ;;  %v667_v62 = vld [vmem:[#allocation8 + $0x8] sm:$0xff]  ;;  %v666_v63 = vld [vmem:[#allocation8] sm:$0xff]  ;;  %v959_v0 = vld [vmem:[#allocation10 + $0x78] sm:$0xff]  ;;  %p2130_p1 = scmp.lt.s32.totalorder %s2128_s7, %s2122_s25 }
  0x9b   : > { %1641 = vmatpush3.xpose.msra.mxu0 %v398_v6  ;;  %v2496_v1 = vld [vmem:[#allocation10 + $0x70] sm:$0xff]  ;;  %v2499_v2 = vld [vmem:[#allocation10 + $0x68] sm:$0xff]  ;;  %v2503_v3 = vld [vmem:[#allocation10 + $0x60] sm:$0xff] }
  0x9c   : > { %1642 = vmatprep.subr.mxu0 %v397_v9  ;;  %v2507_v4 = vld [vmem:[#allocation10 + $0x58] sm:$0xff]  ;;  %v2511_v5 = vld [vmem:[#allocation10 + $0x50] sm:$0xff]  ;;  %v2515_v6 = vld [vmem:[#allocation10 + $0x48] sm:$0xff]  ;;  %p2131_p4 = por %p2130_p1, %p2129_p10 }
  0x9d   : > { %1721 = vmatpush3.xpose.msra.mxu1 %v676_v16  ;;  %v2519_v7 = vld [vmem:[#allocation10 + $0x40] sm:$0xff]  ;;  %v2523_v8 = vld [vmem:[#allocation10 + $0x38] sm:$0xff]  ;;  %v2531_v10 = vld [vmem:[#allocation10 + $0x28] sm:$0xff] }
  0x9e   : > { %1722 = vmatprep.subr.mxu1 %v675_v18  ;;  %v2539_v12 = vld [vmem:[#allocation10 + $0x18] sm:$0xff]  ;;  %v2551_v14 = vld [vmem:[%s2807_s5] ss:$0 sm:$0xff]  ;;  %p2132_p6 = pnand %p2131_p4, %p2125_p2 }
  0x9f   : > { %1643 = vmatpush3.xpose.msra.mxu0 %v397_v9  ;;  %v2527_v9 = vld [vmem:[#allocation10 + $0x30] sm:$0xff] }
  0xa0   : > { %1644 = vmatprep.subr.mxu0 %v396_v11 }
  0xa1   : > { %1723 = vmatpush3.xpose.msra.mxu1 %v675_v18 }
  0xa2   : > { %1724 = vmatprep.subr.mxu1 %v674_v20 }
  0xa3   : > { %1645 = vmatpush3.xpose.msra.mxu0 %v396_v11  ;;  %v2535_v11 = vld [vmem:[#allocation10 + $0x20] sm:$0xff] }
  0xa4   : > { %1646 = vmatprep.subr.mxu0 %v395_v13 }
  0xa5   : > { %1725 = vmatpush3.xpose.msra.mxu1 %v674_v20 }
  0xa6   : > { %1726 = vmatprep.subr.mxu1 %v673_v22 }
  0xa7   : > { %1647 = vmatpush3.xpose.msra.mxu0 %v395_v13  ;;  %v2543_v13 = vld [vmem:[#allocation10 + $0x10] sm:$0xff] }
  0xa8   : > { %1648 = vmatprep.subr.mxu0 %v394_v15 }
  0xa9   : > { %1727 = vmatpush3.xpose.msra.mxu1 %v673_v22 }
  0xaa   : > { %1728 = vmatprep.subr.mxu1 %v672_v24 }
  0xab   : > { %1649 = vmatpush3.xpose.msra.mxu0 %v394_v15 }
  0xac   : > { %1650 = vmatprep.subr.mxu0 %v393_v17 }
  0xad   : > { %1729 = vmatpush3.xpose.msra.mxu1 %v672_v24 }
  0xae   : > { %1730 = vmatprep.subr.mxu1 %v671_v26 }
  0xaf   : > { %1651 = vmatpush3.xpose.msra.mxu0 %v393_v17 }
  0xb0   : > { %1652 = vmatprep.subr.mxu0 %v392_v19 }
  0xb1   : > { %1731 = vmatpush3.xpose.msra.mxu1 %v671_v26 }
  0xb2   : > { %1732 = vmatprep.subr.mxu1 %v670_v28 }
  0xb3   : > { %1653 = vmatpush3.xpose.msra.mxu0 %v392_v19 }
  0xb4   : > { %1654 = vmatprep.subr.mxu0 %v391_v21 }
  0xb5   : > { %1733 = vmatpush3.xpose.msra.mxu1 %v670_v28 }
  0xb6   : > { %1734 = vmatprep.subr.mxu1 %v669_v29 }
  0xb7   : > { %1655 = vmatpush3.xpose.msra.mxu0 %v391_v21 }
  0xb8   : > { %1656 = vmatprep.subr.mxu0 %v390_v23 }
  0xb9   : > { %1735 = vmatpush3.xpose.msra.mxu1 %v669_v29 }
  0xba   : > { %1736 = vmatprep.subr.mxu1 %v668_v32 }
  0xbb   : > { %1657 = vmatpush3.xpose.msra.mxu0 %v390_v23 }
  0xbc   : > { %1658 = vmatprep.subr.mxu0 %v389_v25 }
  0xbd   : > { %1737 = vmatpush3.xpose.msra.mxu1 %v668_v32 }
  0xbe   : > { %1738 = vmatprep.subr.mxu1 %v667_v62 }
  0xbf   : > { %1659 = vmatpush3.xpose.msra.mxu0 %v389_v25 }
  0xc0   : > { %1660 = vmatprep.subr.mxu0 %v388_v27 }
  0xc1   : > { %1739 = vmatpush3.xpose.msra.mxu1 %v667_v62 }
  0xc2   : > { %1740 = vmatprep.subr.mxu1 %v666_v63 }
  0xc3   : > { %1661 = vmatpush3.xpose.msra.mxu0 %v388_v27 }
  0xc4   : > { %1790 = vmatprep.subr.mxu0 %v959_v0 }
  0xc5   : > { %1741 = vmatpush3.xpose.msra.mxu1 %v666_v63 }
  0xc6   : > { %1663 = vmatmul.mubr.f32.vlgmr.msra.gmra.mxu0 %v357_v30  ;;  %1870 = vmatprep.subr.mxu1 %v959_v0 }
  0xc7   : > { %1665 = vmatprep.mubr.f32.mxu0 %v358_v31  ;;  %1791 = vmatpush3.xpose.msra.mxu0 %v959_v0 }
  0xc8   : > { %1792 = vmatprep.subr.mxu0 %v2496_v1 }
  0xca   : > { %1666 = vmatmul.mubr.f32.gmra.mxu0 %v359_v33 }
  0xcb   : > { %1668 = vmatprep.mubr.f32.mxu0 %v360_v34  ;;  %1793 = vmatpush3.xpose.msra.mxu0 %v2496_v1 }
  0xcc   : > { %1794 = vmatprep.subr.mxu0 %v2499_v2 }
  0xce   : > { %1669 = vmatmul.mubr.f32.gmra.mxu0 %v361_v35 }
  0xcf   : > { %1671 = vmatprep.mubr.f32.mxu0 %v362_v36  ;;  %1795 = vmatpush3.xpose.msra.mxu0 %v2499_v2 }
  0xd0   : > { %1796 = vmatprep.subr.mxu0 %v2503_v3 }
  0xd2   : > { %1672 = vmatmul.mubr.f32.gmra.mxu0 %v363_v37 }
  0xd3   : > { %1674 = vmatprep.mubr.f32.mxu0 %v364_v38  ;;  %1797 = vmatpush3.xpose.msra.mxu0 %v2503_v3 }
  0xd4   : > { %1798 = vmatprep.subr.mxu0 %v2507_v4 }
  0xd6   : > { %1675 = vmatmul.mubr.f32.gmra.mxu0 %v365_v39 }
  0xd7   : > { %1677 = vmatprep.mubr.f32.mxu0 %v366_v40  ;;  %1799 = vmatpush3.xpose.msra.mxu0 %v2507_v4 }
  0xd8   : > { %1800 = vmatprep.subr.mxu0 %v2511_v5 }
  0xda   : > { %1678 = vmatmul.mubr.f32.gmra.mxu0 %v367_v41 }
  0xdb   : > { %1680 = vmatprep.mubr.f32.mxu0 %v368_v42  ;;  %1801 = vmatpush3.xpose.msra.mxu0 %v2511_v5 }
  0xdc   : > { %1802 = vmatprep.subr.mxu0 %v2515_v6 }
  0xde   : > { %1681 = vmatmul.mubr.f32.gmra.mxu0 %v369_v43 }
  0xdf   : > { %1683 = vmatprep.mubr.f32.mxu0 %v370_v44  ;;  %1803 = vmatpush3.xpose.msra.mxu0 %v2515_v6 }
  0xe0   : > { %1804 = vmatprep.subr.mxu0 %v2519_v7 }
  0xe2   : > { %1684 = vmatmul.mubr.f32.gmra.mxu0 %v371_v45 }
  0xe3   : > { %1686 = vmatprep.mubr.f32.mxu0 %v372_v46  ;;  %1805 = vmatpush3.xpose.msra.mxu0 %v2519_v7 }
  0xe4   : > { %1806 = vmatprep.subr.mxu0 %v2523_v8 }
  0xe6   : > { %1687 = vmatmul.mubr.f32.gmra.mxu0 %v373_v47 }
  0xe7   : > { %1689 = vmatprep.mubr.f32.mxu0 %v374_v48  ;;  %1807 = vmatpush3.xpose.msra.mxu0 %v2523_v8 }
  0xe8   : > { %1808 = vmatprep.subr.mxu0 %v2527_v9 }
  0xea   : > { %1690 = vmatmul.mubr.f32.gmra.mxu0 %v375_v49 }
  0xeb   : > { %1692 = vmatprep.mubr.f32.mxu0 %v376_v50  ;;  %1809 = vmatpush3.xpose.msra.mxu0 %v2527_v9 }
  0xec   : > { %1810 = vmatprep.subr.mxu0 %v2531_v10 }
  0xee   : > { %1693 = vmatmul.mubr.f32.gmra.mxu0 %v377_v51 }
  0xef   : > { %1695 = vmatprep.mubr.f32.mxu0 %v378_v52  ;;  %1811 = vmatpush3.xpose.msra.mxu0 %v2531_v10 }
  0xf0   : > { %1812 = vmatprep.subr.mxu0 %v2535_v11 }
  0xf2   : > { %1696 = vmatmul.mubr.f32.gmra.mxu0 %v379_v53 }
  0xf3   : > { %1698 = vmatprep.mubr.f32.mxu0 %v380_v54  ;;  %1813 = vmatpush3.xpose.msra.mxu0 %v2535_v11 }
  0xf4   : > { %1814 = vmatprep.subr.mxu0 %v2539_v12 }
  0xf6   : > { %1699 = vmatmul.mubr.f32.gmra.mxu0 %v381_v55 }
  0xf7   : > { %1701 = vmatprep.mubr.f32.mxu0 %v382_v56  ;;  %1815 = vmatpush3.xpose.msra.mxu0 %v2539_v12 }
  0xf8   : > { %1816 = vmatprep.subr.mxu0 %v2543_v13 }
  0xfa   : > { %1702 = vmatmul.mubr.f32.gmra.mxu0 %v383_v57 }
  0xfb   : > { %1704 = vmatprep.mubr.f32.mxu0 %v384_v58  ;;  %1817 = vmatpush3.xpose.msra.mxu0 %v2543_v13 }
  0xfe   : > { %1705 = vmatmul.mubr.f32.gmra.mxu0 %v385_v59 }
  0xff   : > { %1707 = vmatprep.mubr.f32.mxu0 %v386_v60 }
 0x102   : > { %1708 = vmatmul.mubr.f32.gmra.mxu0 %v387_v61 }
 0x186   : > { %v1664_v15 = vpop.f32.mrf.mxu0 }
 0x187   : > { %v481_v16 = vadd.f32 %v1664_v15, %v2551_v14 }
 0x188   : > { %v475_v17 = vpop.f32.mrf.mxu0 }
 0x189   : > { %v476_v18 = vadd.f32 %v2551_v14, %v475_v17  ;;  %v635_v21 = vmax.f32 %v481_v16, 0.0 }
 0x18a   : > { %v1667_v19 = vpop.f32.mrf.mxu0 }
 0x18b   : > { %v634_v20 = vmax.f32 %v476_v18, 0.0  ;;  %v491_v22 = vadd.f32 %v1667_v19, %v2551_v14 }
 0x18c   : > { %v485_v23 = vpop.f32.mrf.mxu0 }
 0x18d   : > { %v486_v24 = vadd.f32 %v2551_v14, %v485_v23  ;;  %1742 = vmatprep.mubr.f32.mxu1 %v634_v20  ;;  %v637_v27 = vmax.f32 %v491_v22, 0.0 }
 0x18e   : > { %v1670_v25 = vpop.f32.mrf.mxu0  ;;  %1743 = vmatmul.mubr.f32.vlgmr.msra.gmra.mxu1 %v635_v21 }
 0x18f   : > { %v636_v26 = vmax.f32 %v486_v24, 0.0  ;;  %1886 = vmatpush3.xpose.msra.mxu1 %v959_v0  ;;  %v501_v28 = vadd.f32 %v1670_v25, %v2551_v14 }
 0x190   : > { %v495_v29 = vpop.f32.mrf.mxu0  ;;  %1871 = vmatprep.subr.mxu1 %v2496_v1 }
 0x191   : > { %v496_v30 = vadd.f32 %v2551_v14, %v495_v29  ;;  %1745 = vmatprep.mubr.f32.mxu1 %v636_v26  ;;  %v639_v33 = vmax.f32 %v501_v28, 0.0 }
 0x192   : > { %v1673_v31 = vpop.f32.mrf.mxu0  ;;  %1746 = vmatmul.mubr.f32.gmra.mxu1 %v637_v27 }
 0x193   : > { %v638_v32 = vmax.f32 %v496_v30, 0.0  ;;  %1887 = vmatpush3.xpose.msra.mxu1 %v2496_v1  ;;  %v511_v34 = vadd.f32 %v1673_v31, %v2551_v14 }
 0x194   : > { %v505_v35 = vpop.f32.mrf.mxu0  ;;  %1872 = vmatprep.subr.mxu1 %v2499_v2 }
 0x195   : > { %v506_v36 = vadd.f32 %v2551_v14, %v505_v35  ;;  %1748 = vmatprep.mubr.f32.mxu1 %v638_v32  ;;  %v641_v39 = vmax.f32 %v511_v34, 0.0 }
 0x196   : > { %v1676_v37 = vpop.f32.mrf.mxu0  ;;  %1749 = vmatmul.mubr.f32.gmra.mxu1 %v639_v33 }
 0x197   : > { %v640_v38 = vmax.f32 %v506_v36, 0.0  ;;  %1888 = vmatpush3.xpose.msra.mxu1 %v2499_v2  ;;  %v521_v40 = vadd.f32 %v1676_v37, %v2551_v14 }
 0x198   : > { %v515_v41 = vpop.f32.mrf.mxu0  ;;  %1873 = vmatprep.subr.mxu1 %v2503_v3 }
 0x199   : > { %v516_v42 = vadd.f32 %v2551_v14, %v515_v41  ;;  %1751 = vmatprep.mubr.f32.mxu1 %v640_v38  ;;  %v643_v45 = vmax.f32 %v521_v40, 0.0 }
 0x19a   : > { %v1679_v43 = vpop.f32.mrf.mxu0  ;;  %1752 = vmatmul.mubr.f32.gmra.mxu1 %v641_v39 }
 0x19b   : > { %v642_v44 = vmax.f32 %v516_v42, 0.0  ;;  %1889 = vmatpush3.xpose.msra.mxu1 %v2503_v3  ;;  %v531_v46 = vadd.f32 %v1679_v43, %v2551_v14 }
 0x19c   : > { %v525_v47 = vpop.f32.mrf.mxu0  ;;  %1874 = vmatprep.subr.mxu1 %v2507_v4 }
 0x19d   : > { %v526_v48 = vadd.f32 %v2551_v14, %v525_v47  ;;  %1754 = vmatprep.mubr.f32.mxu1 %v642_v44  ;;  %v645_v51 = vmax.f32 %v531_v46, 0.0 }
 0x19e   : > { %v1682_v49 = vpop.f32.mrf.mxu0  ;;  %1755 = vmatmul.mubr.f32.gmra.mxu1 %v643_v45 }
 0x19f   : > { %v644_v50 = vmax.f32 %v526_v48, 0.0  ;;  %1890 = vmatpush3.xpose.msra.mxu1 %v2507_v4  ;;  %v541_v52 = vadd.f32 %v1682_v49, %v2551_v14  ;;  %v945_v49 = vld [vmem:[#allocation10 + $0x8] sm:$0xff] }
 0x1a0   : > { %v535_v53 = vpop.f32.mrf.mxu0  ;;  %1875 = vmatprep.subr.mxu1 %v2511_v5  ;;  %1818 = vmatprep.subr.mxu0 %v945_v49 }
 0x1a1   : > { %v536_v54 = vadd.f32 %v2551_v14, %v535_v53  ;;  %1757 = vmatprep.mubr.f32.mxu1 %v644_v50  ;;  %v647_v57 = vmax.f32 %v541_v52, 0.0  ;;  %1819 = vmatpush3.xpose.msra.mxu0 %v945_v49  ;;  %v944_v50 = vld [vmem:[#allocation10] sm:$0xff] }
 0x1a2   : > { %v1685_v55 = vpop.f32.mrf.mxu0  ;;  %1758 = vmatmul.mubr.f32.gmra.mxu1 %v645_v51  ;;  %1820 = vmatprep.subr.mxu0 %v944_v50 }
 0x1a3   : > { %v646_v56 = vmax.f32 %v536_v54, 0.0  ;;  %1891 = vmatpush3.xpose.msra.mxu1 %v2511_v5  ;;  %v551_v58 = vadd.f32 %v1685_v55, %v2551_v14 }
 0x1a4   : > { %v545_v59 = vpop.f32.mrf.mxu0  ;;  %1876 = vmatprep.subr.mxu1 %v2515_v6 }
 0x1a5   : > { %v546_v60 = vadd.f32 %v2551_v14, %v545_v59  ;;  %1760 = vmatprep.mubr.f32.mxu1 %v646_v56  ;;  %v649_v63 = vmax.f32 %v551_v58, 0.0  ;;  %1821 = vmatpush3.xpose.msra.mxu0 %v944_v50 }
 0x1a6   : > { %v1688_v61 = vpop.f32.mrf.mxu0  ;;  %1761 = vmatmul.mubr.f32.gmra.mxu1 %v647_v57 }
 0x1a7   : > { %v648_v62 = vmax.f32 %v546_v60, 0.0  ;;  %1892 = vmatpush3.xpose.msra.mxu1 %v2515_v6  ;;  %v561_v0 = vadd.f32 %v1688_v61, %v2551_v14 }
 0x1a8   : > { %v555_v1 = vpop.f32.mrf.mxu0  ;;  %1877 = vmatprep.subr.mxu1 %v2519_v7 }
 0x1a9   : > { %v556_v2 = vadd.f32 %v2551_v14, %v555_v1  ;;  %1763 = vmatprep.mubr.f32.mxu1 %v648_v62  ;;  %v651_v5 = vmax.f32 %v561_v0, 0.0 }
 0x1aa   : > { %v1691_v3 = vpop.f32.mrf.mxu0  ;;  %1764 = vmatmul.mubr.f32.gmra.mxu1 %v649_v63 }
 0x1ab   : > { %v650_v4 = vmax.f32 %v556_v2, 0.0  ;;  %1893 = vmatpush3.xpose.msra.mxu1 %v2519_v7  ;;  %v571_v15 = vadd.f32 %v1691_v3, %v2551_v14 }
 0x1ac   : > { %v565_v16 = vpop.f32.mrf.mxu0  ;;  %1878 = vmatprep.subr.mxu1 %v2523_v8 }
 0x1ad   : > { %v566_v6 = vadd.f32 %v2551_v14, %v565_v16  ;;  %1766 = vmatprep.mubr.f32.mxu1 %v650_v4  ;;  %v653_v19 = vmax.f32 %v571_v15, 0.0 }
 0x1ae   : > { %v1694_v17 = vpop.f32.mrf.mxu0  ;;  %1767 = vmatmul.mubr.f32.gmra.mxu1 %v651_v5 }
 0x1af   : > { %v652_v18 = vmax.f32 %v566_v6, 0.0  ;;  %1894 = vmatpush3.xpose.msra.mxu1 %v2523_v8  ;;  %v581_v20 = vadd.f32 %v1694_v17, %v2551_v14 }
 0x1b0   : > { %v575_v21 = vpop.f32.mrf.mxu0  ;;  %1879 = vmatprep.subr.mxu1 %v2527_v9 }
 0x1b1   : > { %v576_v7 = vadd.f32 %v2551_v14, %v575_v21  ;;  %1769 = vmatprep.mubr.f32.mxu1 %v652_v18  ;;  %v655_v24 = vmax.f32 %v581_v20, 0.0 }
 0x1b2   : > { %v1697_v22 = vpop.f32.mrf.mxu0  ;;  %1770 = vmatmul.mubr.f32.gmra.mxu1 %v653_v19 }
 0x1b3   : > { %v654_v23 = vmax.f32 %v576_v7, 0.0  ;;  %1895 = vmatpush3.xpose.msra.mxu1 %v2527_v9  ;;  %v591_v25 = vadd.f32 %v1697_v22, %v2551_v14 }
 0x1b4   : > { %v585_v26 = vpop.f32.mrf.mxu0  ;;  %1880 = vmatprep.subr.mxu1 %v2531_v10 }
 0x1b5   : > { %v586_v8 = vadd.f32 %v2551_v14, %v585_v26  ;;  %1772 = vmatprep.mubr.f32.mxu1 %v654_v23  ;;  %v657_v29 = vmax.f32 %v591_v25, 0.0 }
 0x1b6   : > { %v1700_v27 = vpop.f32.mrf.mxu0  ;;  %1773 = vmatmul.mubr.f32.gmra.mxu1 %v655_v24 }
 0x1b7   : > { %v656_v28 = vmax.f32 %v586_v8, 0.0  ;;  %1896 = vmatpush3.xpose.msra.mxu1 %v2531_v10  ;;  %v601_v30 = vadd.f32 %v1700_v27, %v2551_v14 }
 0x1b8   : > { %v595_v31 = vpop.f32.mrf.mxu0  ;;  %1881 = vmatprep.subr.mxu1 %v2535_v11 }
 0x1b9   : > { %v596_v9 = vadd.f32 %v2551_v14, %v595_v31  ;;  %1775 = vmatprep.mubr.f32.mxu1 %v656_v28  ;;  %v659_v34 = vmax.f32 %v601_v30, 0.0 }
 0x1ba   : > { %v1703_v32 = vpop.f32.mrf.mxu0  ;;  %1776 = vmatmul.mubr.f32.gmra.mxu1 %v657_v29 }
 0x1bb   : > { %v658_v33 = vmax.f32 %v596_v9, 0.0  ;;  %1897 = vmatpush3.xpose.msra.mxu1 %v2535_v11  ;;  %v611_v35 = vadd.f32 %v1703_v32, %v2551_v14 }
 0x1bc   : > { %v605_v36 = vpop.f32.mrf.mxu0  ;;  %1882 = vmatprep.subr.mxu1 %v2539_v12 }
 0x1bd   : > { %v606_v10 = vadd.f32 %v2551_v14, %v605_v36  ;;  %1778 = vmatprep.mubr.f32.mxu1 %v658_v33  ;;  %v661_v39 = vmax.f32 %v611_v35, 0.0 }
 0x1be   : > { %v1706_v37 = vpop.f32.mrf.mxu0  ;;  %1779 = vmatmul.mubr.f32.gmra.mxu1 %v659_v34 }
 0x1bf   : > { %v660_v38 = vmax.f32 %v606_v10, 0.0  ;;  %1898 = vmatpush3.xpose.msra.mxu1 %v2539_v12  ;;  %v621_v40 = vadd.f32 %v1706_v37, %v2551_v14 }
 0x1c0   : > { %v615_v41 = vpop.f32.mrf.mxu0  ;;  %1883 = vmatprep.subr.mxu1 %v2543_v13 }
 0x1c1   : > { %v616_v11 = vadd.f32 %v2551_v14, %v615_v41  ;;  %1781 = vmatprep.mubr.f32.mxu1 %v660_v38  ;;  %v663_v44 = vmax.f32 %v621_v40, 0.0 }
 0x1c2   : > { %v1709_v42 = vpop.f32.mrf.mxu0  ;;  %1782 = vmatmul.mubr.f32.gmra.mxu1 %v661_v39 }
 0x1c3   : > { %v662_v43 = vmax.f32 %v616_v11, 0.0  ;;  %1899 = vmatpush3.xpose.msra.mxu1 %v2543_v13  ;;  %v631_v45 = vadd.f32 %v1709_v42, %v2551_v14  ;;  %v2614_v13 = vld [vmem:[%s2807_s5 + $0x1] ss:$0 sm:$0xff] }
 0x1c4   : > { %v625_v46 = vpop.f32.mrf.mxu0  ;;  %1884 = vmatprep.subr.mxu1 %v945_v49 }
 0x1c5   : > { %v626_v12 = vadd.f32 %v2551_v14, %v625_v46  ;;  %1784 = vmatprep.mubr.f32.mxu1 %v662_v43  ;;  %v665_v48 = vmax.f32 %v631_v45, 0.0 }
 0x1c6   : > { %1785 = vmatmul.mubr.f32.gmra.mxu1 %v663_v44 }
 0x1c7   : > { %v664_v47 = vmax.f32 %v626_v12, 0.0  ;;  %1900 = vmatpush3.xpose.msra.mxu1 %v945_v49 }
 0x1c8   : > { %1885 = vmatprep.subr.mxu1 %v944_v50 }
 0x1c9   : > { %1787 = vmatprep.mubr.f32.mxu1 %v664_v47 }
 0x1ca   : > { %1788 = vmatmul.mubr.f32.gmra.mxu1 %v665_v48 }
 0x1cb   : > { %1901 = vmatpush3.xpose.msra.mxu1 %v944_v50 }
 0x24e   : > { %v1744_v14 = vpop.f32.mrf.mxu1 }
 0x24f   : > { %v759_v51 = vadd.f32 %v1744_v14, %v2614_v13 }
 0x250   : > { %v753_v52 = vpop.f32.mrf.mxu1 }
 0x251   : > { %v754_v53 = vadd.f32 %v2614_v13, %v753_v52  ;;  %v913_v56 = vmax.f32 %v759_v51, 0.0 }
 0x252   : > { %v1747_v54 = vpop.f32.mrf.mxu1 }
 0x253   : > { %v912_v55 = vmax.f32 %v754_v53, 0.0  ;;  %v769_v57 = vadd.f32 %v1747_v54, %v2614_v13 }
 0x254   : > { %v763_v58 = vpop.f32.mrf.mxu1 }
 0x255   : > { %v764_v59 = vadd.f32 %v2614_v13, %v763_v58  ;;  %1822 = vmatprep.mubr.f32.mxu0 %v912_v55  ;;  %v915_v62 = vmax.f32 %v769_v57, 0.0 }
 0x256   : > { %v1750_v60 = vpop.f32.mrf.mxu1  ;;  %1823 = vmatmul.mubr.f32.vlgmr.msra.gmra.mxu0 %v913_v56 }
 0x257   : > { %v914_v61 = vmax.f32 %v764_v59, 0.0  ;;  %v779_v63 = vadd.f32 %v1750_v60, %v2614_v13 }
 0x258   : > { %v773_v0 = vpop.f32.mrf.mxu1 }
 0x259   : > { %v774_v1 = vadd.f32 %v2614_v13, %v773_v0  ;;  %1825 = vmatprep.mubr.f32.mxu0 %v914_v61  ;;  %v917_v4 = vmax.f32 %v779_v63, 0.0 }
 0x25a   : > { %v1753_v2 = vpop.f32.mrf.mxu1  ;;  %1826 = vmatmul.mubr.f32.gmra.mxu0 %v915_v62 }
 0x25b   : > { %v916_v3 = vmax.f32 %v774_v1, 0.0  ;;  %v789_v5 = vadd.f32 %v1753_v2, %v2614_v13 }
 0x25c   : > { %v783_v15 = vpop.f32.mrf.mxu1 }
 0x25d   : > { %v784_v16 = vadd.f32 %v2614_v13, %v783_v15  ;;  %1828 = vmatprep.mubr.f32.mxu0 %v916_v3  ;;  %v919_v18 = vmax.f32 %v789_v5, 0.0 }
 0x25e   : > { %v1756_v6 = vpop.f32.mrf.mxu1  ;;  %1829 = vmatmul.mubr.f32.gmra.mxu0 %v917_v4 }
 0x25f   : > { %v918_v17 = vmax.f32 %v784_v16, 0.0  ;;  %v799_v19 = vadd.f32 %v1756_v6, %v2614_v13 }
 0x260   : > { %v793_v20 = vpop.f32.mrf.mxu1 }
 0x261   : > { %v794_v21 = vadd.f32 %v2614_v13, %v793_v20  ;;  %1831 = vmatprep.mubr.f32.mxu0 %v918_v17  ;;  %v921_v23 = vmax.f32 %v799_v19, 0.0 }
 0x262   : > { %v1759_v7 = vpop.f32.mrf.mxu1  ;;  %1832 = vmatmul.mubr.f32.gmra.mxu0 %v919_v18 }
 0x263   : > { %v920_v22 = vmax.f32 %v794_v21, 0.0  ;;  %v809_v24 = vadd.f32 %v1759_v7, %v2614_v13 }
 0x264   : > { %v803_v25 = vpop.f32.mrf.mxu1 }
 0x265   : > { %v804_v26 = vadd.f32 %v2614_v13, %v803_v25  ;;  %1834 = vmatprep.mubr.f32.mxu0 %v920_v22  ;;  %v923_v28 = vmax.f32 %v809_v24, 0.0 }
 0x266   : > { %v1762_v8 = vpop.f32.mrf.mxu1  ;;  %1835 = vmatmul.mubr.f32.gmra.mxu0 %v921_v23 }
 0x267   : > { %v922_v27 = vmax.f32 %v804_v26, 0.0  ;;  %v819_v29 = vadd.f32 %v1762_v8, %v2614_v13  ;;  %v2651_v26 = vld [vmem:[%s2807_s5 + $0x2] ss:$0 sm:$0xff] }
 0x268   : > { %v813_v30 = vpop.f32.mrf.mxu1 }
 0x269   : > { %v814_v31 = vadd.f32 %v2614_v13, %v813_v30  ;;  %1837 = vmatprep.mubr.f32.mxu0 %v922_v27  ;;  %v925_v33 = vmax.f32 %v819_v29, 0.0 }
 0x26a   : > { %v1765_v9 = vpop.f32.mrf.mxu1  ;;  %1838 = vmatmul.mubr.f32.gmra.mxu0 %v923_v28  ;;  %v1223_v28 = vld [vmem:[%s2450_s2 + $0x8] sm:$0xff] }
 0x26b   : > { %v924_v32 = vmax.f32 %v814_v31, 0.0  ;;  %v829_v34 = vadd.f32 %v1765_v9, %v2614_v13  ;;  %v1222_v31 = vld [vmem:[%s2450_s2] sm:$0xff] }
 0x26c   : > { %v823_v35 = vpop.f32.mrf.mxu1 }
 0x26d   : > { %v824_v36 = vadd.f32 %v2614_v13, %v823_v35  ;;  %1840 = vmatprep.mubr.f32.mxu0 %v924_v32  ;;  %v927_v38 = vmax.f32 %v829_v34, 0.0  ;;  %v1225_v35 = vld [vmem:[%s2450_s2 + $0x18] sm:$0xff] }
 0x26e   : > { %v1768_v10 = vpop.f32.mrf.mxu1  ;;  %1841 = vmatmul.mubr.f32.gmra.mxu0 %v925_v33 }
 0x26f   : > { %v926_v37 = vmax.f32 %v824_v36, 0.0  ;;  %v839_v39 = vadd.f32 %v1768_v10, %v2614_v13 }
 0x270   : > { %v833_v40 = vpop.f32.mrf.mxu1 }
 0x271   : > { %v834_v41 = vadd.f32 %v2614_v13, %v833_v40  ;;  %1843 = vmatprep.mubr.f32.mxu0 %v926_v37  ;;  %v929_v43 = vmax.f32 %v839_v39, 0.0  ;;  %v1224_v39 = vld [vmem:[%s2450_s2 + $0x10] sm:$0xff] }
 0x272   : > { %v1771_v11 = vpop.f32.mrf.mxu1  ;;  %1844 = vmatmul.mubr.f32.gmra.mxu0 %v927_v38 }
 0x273   : > { %v928_v42 = vmax.f32 %v834_v41, 0.0  ;;  %v849_v44 = vadd.f32 %v1771_v11, %v2614_v13 }
 0x274   : > { %v843_v45 = vpop.f32.mrf.mxu1 }
 0x275   : > { %v844_v46 = vadd.f32 %v2614_v13, %v843_v45  ;;  %1846 = vmatprep.mubr.f32.mxu1 %v928_v42  ;;  %v931_v48 = vmax.f32 %v849_v44, 0.0 }
 0x276   : > { %v1774_v12 = vpop.f32.mrf.mxu1  ;;  %1847 = vmatmul.mubr.f32.vlgmr.msra.gmra.mxu1 %v929_v43  ;;  %v1227_v43 = vld [vmem:[%s2450_s2 + $0x28] sm:$0xff] }
 0x277   : > { %v930_v47 = vmax.f32 %v844_v46, 0.0  ;;  %v859_v49 = vadd.f32 %v1774_v12, %v2614_v13 }
 0x278   : > { %v853_v50 = vpop.f32.mrf.mxu1 }
 0x279   : > { %v854_v14 = vadd.f32 %v2614_v13, %v853_v50  ;;  %1849 = vmatprep.mubr.f32.mxu1 %v930_v47  ;;  %v933_v53 = vmax.f32 %v859_v49, 0.0  ;;  %v1226_v47 = vld [vmem:[%s2450_s2 + $0x20] sm:$0xff] }
 0x27a   : > { %v1777_v51 = vpop.f32.mrf.mxu1  ;;  %1850 = vmatmul.mubr.f32.gmra.mxu1 %v931_v48 }
 0x27b   : > { %v932_v52 = vmax.f32 %v854_v14, 0.0  ;;  %v869_v54 = vadd.f32 %v1777_v51, %v2614_v13  ;;  %v1229_v51 = vld [vmem:[%s2450_s2 + $0x38] sm:$0xff] }
 0x27c   : > { %v863_v55 = vpop.f32.mrf.mxu1 }
 0x27d   : > { %v864_v56 = vadd.f32 %v2614_v13, %v863_v55  ;;  %1852 = vmatprep.mubr.f32.mxu1 %v932_v52  ;;  %v935_v59 = vmax.f32 %v869_v54, 0.0 }
 0x27e   : > { %v1780_v57 = vpop.f32.mrf.mxu1  ;;  %1853 = vmatmul.mubr.f32.gmra.mxu1 %v933_v53 }
 0x27f   : > { %v934_v58 = vmax.f32 %v864_v56, 0.0  ;;  %v879_v60 = vadd.f32 %v1780_v57, %v2614_v13  ;;  %v1228_v56 = vld [vmem:[%s2450_s2 + $0x30] sm:$0xff] }
 0x280   : > { %v873_v61 = vpop.f32.mrf.mxu1 }
 0x281   : > { %v874_v62 = vadd.f32 %v2614_v13, %v873_v61  ;;  %1855 = vmatprep.mubr.f32.mxu1 %v934_v58  ;;  %v937_v1 = vmax.f32 %v879_v60, 0.0  ;;  %v1231_v61 = vld [vmem:[%s2450_s2 + $0x48] sm:$0xff] }
 0x282   : > { %v1783_v63 = vpop.f32.mrf.mxu1  ;;  %1856 = vmatmul.mubr.f32.gmra.mxu1 %v935_v59 }
 0x283   : > { %v936_v0 = vmax.f32 %v874_v62, 0.0  ;;  %v889_v2 = vadd.f32 %v1783_v63, %v2614_v13 }
 0x284   : > { %v883_v3 = vpop.f32.mrf.mxu1 }
 0x285   : > { %v884_v4 = vadd.f32 %v2614_v13, %v883_v3  ;;  %1858 = vmatprep.mubr.f32.mxu1 %v936_v0  ;;  %v939_v16 = vmax.f32 %v889_v2, 0.0  ;;  %v1230_v2 = vld [vmem:[%s2450_s2 + $0x40] sm:$0xff] }
 0x286   : > { %v1786_v5 = vpop.f32.mrf.mxu1  ;;  %1859 = vmatmul.mubr.f32.gmra.mxu1 %v937_v1 }
 0x287   : > { %v938_v15 = vmax.f32 %v884_v4, 0.0  ;;  %v899_v6 = vadd.f32 %v1786_v5, %v2614_v13 }
 0x288   : > { %v893_v17 = vpop.f32.mrf.mxu1 }
 0x289   : > { %v894_v18 = vadd.f32 %v2614_v13, %v893_v17  ;;  %1861 = vmatprep.mubr.f32.mxu1 %v938_v15  ;;  %v941_v21 = vmax.f32 %v899_v6, 0.0 }
 0x28a   : > { %v1789_v19 = vpop.f32.mrf.mxu1  ;;  %1862 = vmatmul.mubr.f32.gmra.mxu1 %v939_v16  ;;  %v1233_v16 = vld [vmem:[%s2450_s2 + $0x58] sm:$0xff] }
 0x28b   : > { %v940_v20 = vmax.f32 %v894_v18, 0.0  ;;  %v909_v7 = vadd.f32 %v1789_v19, %v2614_v13 }
 0x28c   : > { %v903_v22 = vpop.f32.mrf.mxu1 }
 0x28d   : > { %v904_v23 = vadd.f32 %v2614_v13, %v903_v22  ;;  %1864 = vmatprep.mubr.f32.mxu1 %v940_v20  ;;  %v943_v25 = vmax.f32 %v909_v7, 0.0  ;;  %v1232_v20 = vld [vmem:[%s2450_s2 + $0x50] sm:$0xff] }
 0x28e   : > { %1865 = vmatmul.mubr.f32.gmra.mxu1 %v941_v21 }
 0x28f   : > { %v942_v24 = vmax.f32 %v904_v23, 0.0 }
 0x291   : > { %1867 = vmatprep.mubr.f32.mxu1 %v942_v24  ;;  %v1235_v24 = vld [vmem:[%s2450_s2 + $0x68] sm:$0xff] }
 0x292   : > { %1868 = vmatmul.mubr.f32.gmra.mxu1 %v943_v25 }
 0x316   : > { %v1824_v8 = vpop.f32.mrf.mxu0 }
 0x317   : > { %v1037_v27 = vadd.f32 %v1824_v8, %v2651_v26 }
 0x318   : > { %v1031_v29 = vpop.f32.mrf.mxu0 }
 0x319   : > { %v1191_v13 = vmax.f32 %v1037_v27, 0.0  ;;  %v1032_v30 = vadd.f32 %v2651_v26, %v1031_v29  ;;  %v1234_v29 = vld [vmem:[%s2450_s2 + $0x60] sm:$0xff] }
 0x31a   : > { %v1827_v9 = vpop.f32.mrf.mxu0 }
 0x31b   : > { %v1255_v32 = vmul.f32 %v1223_v28, %v1191_v13  ;;  %v1190_v33 = vmax.f32 %v1032_v30, 0.0  ;;  %v1047_v34 = vadd.f32 %v1827_v9, %v2651_v26 }
 0x31c   : > { %v1041_v36 = vpop.f32.mrf.mxu0 }
 0x31d   : > { %1287 = vst [vmem:[%s2660_s15 + $0x8] sm:$0xff] %v1255_v32  ;;  %v1254_v10 = vmul.f32 %v1222_v31, %v1190_v33  ;;  %v1193_v37 = vmax.f32 %v1047_v34, 0.0  ;;  %v1042_v38 = vadd.f32 %v2651_v26, %v1041_v36  ;;  %v1237_v32 = vld [vmem:[%s2450_s2 + $0x78] sm:$0xff] }
 0x31e   : > { %v1830_v40 = vpop.f32.mrf.mxu0 }
 0x31f   : > { %1286 = vst [vmem:[%s2660_s15] sm:$0xff] %v1254_v10  ;;  %v1257_v41 = vmul.f32 %v1225_v35, %v1193_v37  ;;  %v1192_v11 = vmax.f32 %v1042_v38, 0.0  ;;  %v1057_v42 = vadd.f32 %v1830_v40, %v2651_v26  ;;  %v1236_v10 = vld [vmem:[%s2450_s2 + $0x70] sm:$0xff] }
 0x320   : > { %v1051_v44 = vpop.f32.mrf.mxu0 }
 0x321   : > { %1289 = vst [vmem:[%s2660_s15 + $0x18] sm:$0xff] %v1257_v41  ;;  %v1256_v45 = vmul.f32 %v1224_v39, %v1192_v11  ;;  %v1195_v46 = vmax.f32 %v1057_v42, 0.0  ;;  %v1052_v12 = vadd.f32 %v2651_v26, %v1051_v44  ;;  %v1239_v41 = vld [vmem:[%s2450_s2 + $0x88] sm:$0xff] }
 0x322   : > { %v1833_v48 = vpop.f32.mrf.mxu0 }
 0x323   : > { %1288 = vst [vmem:[%s2660_s15 + $0x10] sm:$0xff] %v1256_v45  ;;  %v1259_v49 = vmul.f32 %v1227_v43, %v1195_v46  ;;  %v1194_v50 = vmax.f32 %v1052_v12, 0.0  ;;  %v1067_v14 = vadd.f32 %v1833_v48, %v2651_v26  ;;  %v1238_v45 = vld [vmem:[%s2450_s2 + $0x80] sm:$0xff] }
 0x324   : > { %v1061_v52 = vpop.f32.mrf.mxu0 }
 0x325   : > { %1291 = vst [vmem:[%s2660_s15 + $0x28] sm:$0xff] %v1259_v49  ;;  %v1258_v53 = vmul.f32 %v1226_v47, %v1194_v50  ;;  %v1197_v54 = vmax.f32 %v1067_v14, 0.0  ;;  %v1062_v55 = vadd.f32 %v2651_v26, %v1061_v52  ;;  %v1241_v49 = vld [vmem:[%s2450_s2 + $0x98] sm:$0xff] }
 0x326   : > { %v1836_v57 = vpop.f32.mrf.mxu0 }
 0x327   : > { %1290 = vst [vmem:[%s2660_s15 + $0x20] sm:$0xff] %v1258_v53  ;;  %v1261_v58 = vmul.f32 %v1229_v51, %v1197_v54  ;;  %v1196_v59 = vmax.f32 %v1062_v55, 0.0  ;;  %v1077_v60 = vadd.f32 %v1836_v57, %v2651_v26  ;;  %v1240_v53 = vld [vmem:[%s2450_s2 + $0x90] sm:$0xff] }
 0x328   : > { %v1071_v62 = vpop.f32.mrf.mxu0 }
 0x329   : > { %1293 = vst [vmem:[%s2660_s15 + $0x38] sm:$0xff] %v1261_v58  ;;  %v1260_v63 = vmul.f32 %v1228_v56, %v1196_v59  ;;  %v1199_v0 = vmax.f32 %v1077_v60, 0.0  ;;  %v1072_v1 = vadd.f32 %v2651_v26, %v1071_v62  ;;  %v1243_v58 = vld [vmem:[%s2450_s2 + $0xa8] sm:$0xff] }
 0x32a   : > { %v1839_v3 = vpop.f32.mrf.mxu0 }
 0x32b   : > { %1292 = vst [vmem:[%s2660_s15 + $0x30] sm:$0xff] %v1260_v63  ;;  %v1263_v4 = vmul.f32 %v1231_v61, %v1199_v0  ;;  %v1198_v5 = vmax.f32 %v1072_v1, 0.0  ;;  %v1087_v15 = vadd.f32 %v1839_v3, %v2651_v26  ;;  %v1242_v63 = vld [vmem:[%s2450_s2 + $0xa0] sm:$0xff] }
 0x32c   : > { %v1081_v6 = vpop.f32.mrf.mxu0 }
 0x32d   : > { %1295 = vst [vmem:[%s2660_s15 + $0x48] sm:$0xff] %v1263_v4  ;;  %v1262_v17 = vmul.f32 %v1230_v2, %v1198_v5  ;;  %v1201_v18 = vmax.f32 %v1087_v15, 0.0  ;;  %v1082_v19 = vadd.f32 %v2651_v26, %v1081_v6  ;;  %v1245_v4 = vld [vmem:[%s2450_s2 + $0xb8] sm:$0xff] }
 0x32e   : > { %v1842_v21 = vpop.f32.mrf.mxu0 }
 0x32f   : > { %1294 = vst [vmem:[%s2660_s15 + $0x40] sm:$0xff] %v1262_v17  ;;  %v1265_v7 = vmul.f32 %v1233_v16, %v1201_v18  ;;  %v1200_v22 = vmax.f32 %v1082_v19, 0.0  ;;  %v1097_v23 = vadd.f32 %v1842_v21, %v2651_v26  ;;  %v1244_v17 = vld [vmem:[%s2450_s2 + $0xb0] sm:$0xff] }
 0x330   : > { %v1091_v25 = vpop.f32.mrf.mxu0 }
 0x331   : > { %1297 = vst [vmem:[%s2660_s15 + $0x58] sm:$0xff] %v1265_v7  ;;  %v1264_v8 = vmul.f32 %v1232_v20, %v1200_v22  ;;  %v1203_v27 = vmax.f32 %v1097_v23, 0.0  ;;  %v1092_v28 = vadd.f32 %v2651_v26, %v1091_v25  ;;  %v1247_v7 = vld [vmem:[%s2450_s2 + $0xc8] sm:$0xff] }
 0x332   : > { %v1845_v13 = vpop.f32.mrf.mxu0 }
 0x333   : > { %1296 = vst [vmem:[%s2660_s15 + $0x50] sm:$0xff] %v1264_v8  ;;  %v1267_v30 = vmul.f32 %v1235_v24, %v1203_v27  ;;  %v1202_v31 = vmax.f32 %v1092_v28, 0.0  ;;  %v1107_v9 = vadd.f32 %v1845_v13, %v2651_v26  ;;  %v1246_v8 = vld [vmem:[%s2450_s2 + $0xc0] sm:$0xff] }
 0x334   : > { %v1101_v33 = vpop.f32.mrf.mxu0 }
 0x335   : > { %1299 = vst [vmem:[%s2660_s15 + $0x68] sm:$0xff] %v1267_v30  ;;  %v1266_v34 = vmul.f32 %v1234_v29, %v1202_v31  ;;  %v1205_v35 = vmax.f32 %v1107_v9, 0.0  ;;  %v1102_v36 = vadd.f32 %v2651_v26, %v1101_v33  ;;  %v1249_v30 = vld [vmem:[%s2450_s2 + $0xd8] sm:$0xff] }
 0x336   : > { %v1848_v37 = vpop.f32.mrf.mxu1 }
 0x337   : > { %1298 = vst [vmem:[%s2660_s15 + $0x60] sm:$0xff] %v1266_v34  ;;  %v1269_v38 = vmul.f32 %v1237_v32, %v1205_v35  ;;  %v1204_v39 = vmax.f32 %v1102_v36, 0.0  ;;  %v1117_v40 = vadd.f32 %v1848_v37, %v2651_v26  ;;  %v1248_v34 = vld [vmem:[%s2450_s2 + $0xd0] sm:$0xff] }
 0x338   : > { %v1111_v11 = vpop.f32.mrf.mxu1 }
 0x339   : > { %1301 = vst [vmem:[%s2660_s15 + $0x78] sm:$0xff] %v1269_v38  ;;  %v1268_v42 = vmul.f32 %v1236_v10, %v1204_v39  ;;  %v1207_v43 = vmax.f32 %v1117_v40, 0.0  ;;  %v1112_v44 = vadd.f32 %v2651_v26, %v1111_v11  ;;  %v1251_v38 = vld [vmem:[%s2450_s2 + $0xe8] sm:$0xff] }
 0x33a   : > { %v1851_v46 = vpop.f32.mrf.mxu1 }
 0x33b   : > { %1300 = vst [vmem:[%s2660_s15 + $0x70] sm:$0xff] %v1268_v42  ;;  %v1271_v12 = vmul.f32 %v1239_v41, %v1207_v43  ;;  %v1206_v47 = vmax.f32 %v1112_v44, 0.0  ;;  %v1127_v48 = vadd.f32 %v1851_v46, %v2651_v26  ;;  %v1250_v42 = vld [vmem:[%s2450_s2 + $0xe0] sm:$0xff] }
 0x33c   : > { %v1121_v50 = vpop.f32.mrf.mxu1 }
 0x33d   : > { %1303 = vst [vmem:[%s2660_s15 + $0x88] sm:$0xff] %v1271_v12  ;;  %v1270_v14 = vmul.f32 %v1238_v45, %v1206_v47  ;;  %v1209_v51 = vmax.f32 %v1127_v48, 0.0  ;;  %v1122_v52 = vadd.f32 %v2651_v26, %v1121_v50  ;;  %v1253_v12 = vld [vmem:[%s2450_s2 + $0xf8] sm:$0xff] }
 0x33e   : > { %v1854_v54 = vpop.f32.mrf.mxu1 }
 0x33f   : > { %1302 = vst [vmem:[%s2660_s15 + $0x80] sm:$0xff] %v1270_v14  ;;  %v1273_v55 = vmul.f32 %v1241_v49, %v1209_v51  ;;  %v1208_v56 = vmax.f32 %v1122_v52, 0.0  ;;  %v1137_v57 = vadd.f32 %v1854_v54, %v2651_v26  ;;  %v1252_v14 = vld [vmem:[%s2450_s2 + $0xf0] sm:$0xff] }
 0x340   : > { %v1131_v59 = vpop.f32.mrf.mxu1 }
 0x341   : > { %1305 = vst [vmem:[%s2660_s15 + $0x98] sm:$0xff] %v1273_v55  ;;  %v1272_v60 = vmul.f32 %v1240_v53, %v1208_v56  ;;  %v1211_v61 = vmax.f32 %v1137_v57, 0.0  ;;  %v1132_v62 = vadd.f32 %v2651_v26, %v1131_v59 }
 0x342   : > { %v1857_v0 = vpop.f32.mrf.mxu1 }
 0x343   : > { %1304 = vst [vmem:[%s2660_s15 + $0x90] sm:$0xff] %v1272_v60  ;;  %v1275_v1 = vmul.f32 %v1243_v58, %v1211_v61  ;;  %v1210_v2 = vmax.f32 %v1132_v62, 0.0  ;;  %v1147_v3 = vadd.f32 %v1857_v0, %v2651_v26 }
 0x344   : > { %v1141_v5 = vpop.f32.mrf.mxu1 }
 0x345   : > { %1307 = vst [vmem:[%s2660_s15 + $0xa8] sm:$0xff] %v1275_v1  ;;  %v1274_v15 = vmul.f32 %v1242_v63, %v1210_v2  ;;  %v1213_v16 = vmax.f32 %v1147_v3, 0.0  ;;  %v1142_v6 = vadd.f32 %v2651_v26, %v1141_v5 }
 0x346   : > { %v1860_v18 = vpop.f32.mrf.mxu1 }
 0x347   : > { %1306 = vst [vmem:[%s2660_s15 + $0xa0] sm:$0xff] %v1274_v15  ;;  %v1277_v19 = vmul.f32 %v1245_v4, %v1213_v16  ;;  %v1212_v20 = vmax.f32 %v1142_v6, 0.0  ;;  %v1157_v21 = vadd.f32 %v1860_v18, %v2651_v26 }
 0x348   : > { %v1151_v22 = vpop.f32.mrf.mxu1 }
 0x349   : > { %1309 = vst [vmem:[%s2660_s15 + $0xb8] sm:$0xff] %v1277_v19  ;;  %v1276_v23 = vmul.f32 %v1244_v17, %v1212_v20  ;;  %v1215_v24 = vmax.f32 %v1157_v21, 0.0  ;;  %v1152_v25 = vadd.f32 %v2651_v26, %v1151_v22 }
 0x34a   : > { %v1863_v27 = vpop.f32.mrf.mxu1 }
 0x34b   : > { %1308 = vst [vmem:[%s2660_s15 + $0xb0] sm:$0xff] %v1276_v23  ;;  %v1279_v28 = vmul.f32 %v1247_v7, %v1215_v24  ;;  %v1214_v29 = vmax.f32 %v1152_v25, 0.0  ;;  %v1167_v13 = vadd.f32 %v1863_v27, %v2651_v26 }
 0x34c   : > { %v1161_v31 = vpop.f32.mrf.mxu1 }
 0x34d   : > { %1311 = vst [vmem:[%s2660_s15 + $0xc8] sm:$0xff] %v1279_v28  ;;  %v1278_v9 = vmul.f32 %v1246_v8, %v1214_v29  ;;  %v1217_v32 = vmax.f32 %v1167_v13, 0.0  ;;  %v1162_v33 = vadd.f32 %v2651_v26, %v1161_v31 }
 0x34e   : > { %v1866_v35 = vpop.f32.mrf.mxu1 }
 0x34f   : > { %1310 = vst [vmem:[%s2660_s15 + $0xc0] sm:$0xff] %v1278_v9  ;;  %v1281_v36 = vmul.f32 %v1249_v30, %v1217_v32  ;;  %v1216_v10 = vmax.f32 %v1162_v33, 0.0  ;;  %v1177_v37 = vadd.f32 %v1866_v35, %v2651_v26 }
 0x350   : > { %v1171_v39 = vpop.f32.mrf.mxu1 }
 0x351   : > { %1313 = vst [vmem:[%s2660_s15 + $0xd8] sm:$0xff] %v1281_v36  ;;  %v1280_v40 = vmul.f32 %v1248_v34, %v1216_v10  ;;  %v1219_v41 = vmax.f32 %v1177_v37, 0.0  ;;  %v1172_v11 = vadd.f32 %v2651_v26, %v1171_v39 }
 0x352   : > { %v1869_v43 = vpop.f32.mrf.mxu1 }
 0x353   : > { %1312 = vst [vmem:[%s2660_s15 + $0xd0] sm:$0xff] %v1280_v40  ;;  %v1283_v44 = vmul.f32 %v1251_v38, %v1219_v41  ;;  %v1218_v45 = vmax.f32 %v1172_v11, 0.0  ;;  %v1187_v46 = vadd.f32 %v1869_v43, %v2651_v26 }
 0x354   : > { %v1181_v47 = vpop.f32.mrf.mxu1 }
 0x355   : > { %1315 = vst [vmem:[%s2660_s15 + $0xe8] sm:$0xff] %v1283_v44  ;;  %v1282_v48 = vmul.f32 %v1250_v42, %v1218_v45  ;;  %v1221_v49 = vmax.f32 %v1187_v46, 0.0  ;;  %v1182_v50 = vadd.f32 %v2651_v26, %v1181_v47 }
 0x357   : > { %1314 = vst [vmem:[%s2660_s15 + $0xe0] sm:$0xff] %v1282_v48  ;;  %v1285_v51 = vmul.f32 %v1253_v12, %v1221_v49  ;;  %v1220_v52 = vmax.f32 %v1182_v50, 0.0 }
 0x359   : > { %1317 = vst [vmem:[%s2660_s15 + $0xf8] sm:$0xff] %v1285_v51  ;;  %v1284_v53 = vmul.f32 %v1252_v14, %v1220_v52 }
 0x35b   : > { %1316 = vst [vmem:[%s2660_s15 + $0xf0] sm:$0xff] %v1284_v53 }
 0x35c   : > { %2135 = shalt.err (!%p2132_p6)
}
 0x35d   : > { %s2136_s29 = scalar_lea.hbm %s2755_s30, 4096  ;;  %s2140_s27 = scalar_lea.hbm %s2808_s6, 8192 }
 0x35e   : > { %p2137_p7 = scmp.ne.s32.totalorder %s2755_s30, %s2136_s29  ;;  %p2141_p11 = scmp.lt.s32.totalorder %s2755_s30, %s2808_s6 }
 0x35f   : > { %p2142_p3 = scmp.lt.s32.totalorder %s2140_s27, %s2136_s29 }
 0x360   : > { %p2138_p5 = pnand %p2137_p7, %p2838_p13 }
 0x361   : > { %p2143_p12 = por %p2142_p3, %p2141_p11 }
 0x362   : > { %p2139_p8 = pneg %p2138_p5 }
 0x364   : > { %p2144_p9 = pnand %p2143_p12, %p2139_p8 }
 0x366   : > { %2147 = shalt.err (!%p2144_p9)
}
 0x367   : > { %s2208_s10 = smov 128   ;;  %s2209_s26 = smov 8  }
 0x368   : > { %1918 = dma.vmem_to_hbm [thread:$0]  (%p2838_p13), %s2757_s8, 4096, %s2755_s30, %s1319_s19, %s2208_s10, %s2208_s10, %s2209_s26  }
 0x369 PF: > { %s1347_s16 = sand.u32 1, %s2186_s21   ;;  %p2839_p0 = scmp.ne.s32.totalorder %s2821_s28, 0 }
 0x36a   : > { %p2840_p2 = scmp.ge.s32.totalorder %s2198_s24, 2  ;;  %s1348_s15 = scalar_lea.sflag [#allocation4], %s1347_s16 }
 0x36c   : > { %p1938_p10 = pnand %p2840_p2, %p2839_p0 }
 0x36e   : > { %p1939_p1 = pneg %p1938_p10 }
 0x370   : > { %2181 = dma.done.wait (%p1939_p1), %s1348_s15, 4096  }
 0x371   : > { %2183 = vsyncadd (%p1939_p1), %s1348_s15, 4294963200  ;;  %s2841_s17 = sld [smem:[#allocation17_spill]]  ;;  %p23_p4 = scmp.ge.s32.totalorder %s2334_s9, 4  }
 0x372   : > { %s2842_s21 = smov %s2190_s22  ;;  %s2843_s22 = smov %s2194_s23 }
 0x373   : > { %s2845_s24 = smov %s2334_s9  ;;  %25 = sbr.rel (!%p23_p4) target bundleno = 13 (0xd), region = 114 }
 0x377   : > { %s2844_s23 = smov %s2841_s17 }
 0x378   :  { %1353 = vsyncpa [#allocation3], 1 }
 0x379   :  { %1355 = vsyncpa [#allocation3 + $0x1], 1 }
 0x37a   :  { %1356 = vsyncpa [#allocation6], 1 }
 0x37b   :  { %1358 = vsyncpa [#allocation6 + $0x1], 1 }
 0x37c   :  { %1359 = vsyncpa [#allocation9], 1 }
 0x37d   :  { %1360 = vsyncpa [#allocation4], 1 }
 0x37e   :  { %1362 = vsyncpa [#allocation4 + $0x1], 1 }

// kernel: tpu_custom_call.1
= control target key start
LH: loop header
LB: loop body
LE: loop exit
PB: predicated region body
PF: predicated region fallthrough
CT: control target
= control target key end

     0   :  { %s2802_s0 = inlined_call_operand.hbm [shape: f32[512,128], index: 0, kind: input, shape index: {}]   ;;  %s2803_s1 = inlined_call_operand.hbm [shape: f32[512,128], index: 1, kind: input, shape index: {}]   ;;  %s2804_s2 = inlined_call_operand.hbm [shape: f32[128,128], index: 2, kind: input, shape index: {}]   ;;  %s2805_s3 = inlined_call_operand.hbm [shape: f32[128,128], index: 3, kind: input, shape index: {}]   ;;  %s2806_s4 = inlined_call_operand.hbm [shape: f32[128,128], index: 4, kind: input, shape index: {}]   ;;  %s2807_s5 = inlined_call_operand.vmem [shape: f32[3,128], index: 5, kind: input, shape index: {}]   ;;  %s2808_s6 = inlined_call_operand.hbm [shape: f32[512,128], index: 6, kind: output, shape index: {}]  }
   0x1   :  { %2816 = sst [smem:[#allocation18_spill]] %s2802_s0 }
   0x2   :  { %2817 = sst [smem:[#allocation19_spill]] %s2804_s2 }
   0x3   :  { %2818 = sst [smem:[#allocation20_spill]] %s2805_s3 }
   0x4   :  { %2819 = sst [smem:[#allocation21_spill]] %s2806_s4 }
   0x5   :  { %11 = vsyncpa [#allocation3], 0 }
   0x6   :  { %13 = vsyncpa [#allocation3 + $0x1], 0 }
   0x7   :  { %14 = vsyncpa [#allocation6], 0 }
   0x8   :  { %16 = vsyncpa [#allocation6 + $0x1], 0 }
   0x9   :  { %17 = vsyncpa [#allocation9], 0 }
   0xa   :  { %18 = vsyncpa [#allocation4], 0 }
   0xb   :  { %20 = vsyncpa [#allocation4 + $0x1], 0  ;;  %s2245_s21 = smov 0   ;;  %s2247_s22 = smov 0  }
   0xc   :  { %s2249_s23 = smov 0   ;;  %s2251_s24 = smov 0  }
   0xd LB: > { %s2266_s25 = sadd.s32 4294967295, %s2198_s24   ;;  %s1456_s26 = sadd.s32 4294967294, %s2198_s24   ;;  %s2198_s24 = sphi %s2251_s24, %s2845_s24   ;;  %s2194_s23 = sphi %s2249_s23, %s2844_s23   ;;  %s2190_s22 = sphi %s2247_s22, %s2843_s22   ;;  %s2186_s21 = sphi %s2245_s21, %s2842_s21  }
   0xe   : > { %p46_p0 = scmp.ne.s32.totalorder %s2190_s22, %s2186_s21  ;;  %p2809_p1 = scmp.eq.s32.totalorder %s2266_s25, 0 }
   0xf   : > { %p180_p2 = scmp.eq.s32.totalorder %s2266_s25, 1  ;;  %p186_p3 = scmp.eq.s32.totalorder %s1456_s26, 1 }
  0x10   : > { %p2275_p4 = por %p2809_p1, %p46_p0  ;;  %p1457_p5 = scmp.ge.s32.totalorder %s2198_s24, 1 }
  0x11   : > { %p2280_p6 = por %p186_p3, %p46_p0  ;;  %p193_p7 = scmp.lt.s32.totalorder %s2198_s24, 3 }
  0x12   : > { %s2820_s27 = scalar_select %p2275_p4, 1, 0 }
  0x13   : > { %s2821_s28 = scalar_select %p2280_p6, 1, 0 }
  0x14   : > { %p2285_p8 = pnand %p1457_p5, %p193_p7  ;;  %s2200_s30 = smov [#allocation7]  }
  0x15   : > { %s205_s7 = sshll.u32 %s2200_s30, 4  ;;  %s2201_s9 = smov [#allocation8]   ;;  %s206_s7 = int_to_ptr.vmem [resolvable:$true] %s205_s7 }
  0x16   : > { %p1920_p9 = pneg %p2285_p8  ;;  %s218_s10 = sshll.u32 %s2201_s9, 4  ;;  %s219_s10 = int_to_ptr.vmem [resolvable:$true] %s218_s10 }
  0x17   : > { %s2202_s11 = smov [#allocation10]   ;;  %s1999_s13 = scalar_lea.vmem %s206_s7, 2048 }
  0x18   : > { %p2294_p11 = pnand %p1920_p9, %p2809_p1  ;;  %s231_s12 = sshll.u32 %s2202_s11, 4  ;;  %s232_s12 = int_to_ptr.vmem [resolvable:$true] %s231_s12 }
  0x19   : > { %p2000_p13 = scmp.ne.s32.totalorder %s206_s7, %s1999_s13  ;;  %p2007_p5 = scmp.lt.s32.totalorder %s206_s7, %s206_s7 }
  0x1a   : > { %p1990_p12 = pneg %p2294_p11  ;;  %p2008_p7 = scmp.lt.s32.totalorder %s1999_s13, %s1999_s13 }
  0x1c   : > { %p2002_p0 = pnand %p2000_p13, %p1990_p12  ;;  %p2009_p9 = por %p2008_p7, %p2007_p5 }
  0x1e   : > { %p2003_p3 = pneg %p2002_p0 }
  0x20   : > { %p2010_p10 = pnand %p2009_p9, %p2003_p3 }
  0x22   : > { %2013 = shalt.err (!%p2010_p10)
}
  0x23   : > { %s2810_s14 = smov 128   ;;  %s2812_s15 = smov 8  }
  0x24   : > { %s2824_s2 = sld [smem:[#allocation19_spill]]  ;;  %s2025_s18 = scalar_lea.vmem %s219_s10, 2048 }
  0x25   : > { %p2026_p13 = scmp.ne.s32.totalorder %s219_s10, %s2025_s18  ;;  %p2033_p3 = scmp.lt.s32.totalorder %s219_s10, %s219_s10 }
  0x26   : > { %p2034_p10 = scmp.lt.s32.totalorder %s2025_s18, %s2025_s18 }
  0x27   : > { %p2028_p0 = pnand %p2026_p13, %p1990_p12 }
  0x28   : > { %p2035_p7 = por %p2034_p10, %p2033_p3 }
  0x29   : > { %p2029_p5 = pneg %p2028_p0 }
  0x2a   : > { %1923 = dma.hbm_to_vmem [thread:$0]  (!%p2294_p11), %s2824_s2, 2048, %s206_s7, [#allocation6], %s2810_s14, %s2810_s14, %s2812_s15  }
  0x2b   : > { %p2036_p9 = pnand %p2035_p7, %p2029_p5 }
  0x2d   : > { %2039 = shalt.err (!%p2036_p9)
}
  0x2e   : > { %s2825_s3 = sld [smem:[#allocation20_spill]]  ;;  %s2051_s26 = scalar_lea.vmem %s232_s12, 2048 }
  0x2f   : > { %p2052_p1 = scmp.ne.s32.totalorder %s232_s12, %s2051_s26  ;;  %p2059_p3 = scmp.lt.s32.totalorder %s232_s12, %s232_s12 }
  0x30   : > { %p2060_p5 = scmp.lt.s32.totalorder %s2051_s26, %s2051_s26 }
  0x31   : > { %p2054_p13 = pnand %p2052_p1, %p1990_p12 }
  0x32   : > { %p2061_p10 = por %p2060_p5, %p2059_p3 }
  0x33   : > { %p2055_p0 = pneg %p2054_p13 }
  0x34   : > { %1926 = dma.hbm_to_vmem [thread:$0]  (!%p2294_p11), %s2825_s3, 2048, %s219_s10, [#allocation9], %s2810_s14, %s2810_s14, %s2812_s15  }
  0x35   : > { %p2062_p7 = pnand %p2061_p10, %p2055_p0 }
  0x37   : > { %2065 = shalt.err (!%p2062_p7)
}
  0x38   : > { %s2826_s4 = sld [smem:[#allocation21_spill]]  ;;  %s2334_s9 = sadd.s32 1, %s2198_s24  }
  0x39   : > { %s30_s8 = ssub.s32 %s2198_s24, %s2334_s9  ;;  %s33_s10 = sadd.s32 1, %s2194_s23 }
  0x3a   : > { %p31_p1 = scmp.eq.s32.totalorder %s30_s8, 0  ;;  %p40_p12 = scmp.ne.s32.totalorder %s2194_s23, %s2190_s22 }
  0x3b   : > { %p41_p9 = scmp.eq.s32.totalorder %s2198_s24, 0  ;;  %p1944_p13 = scmp.lt.s32.totalorder %s2198_s24, 2 }
  0x3c   : > { %s2344_s11 = scalar_select %p31_p1, %s2194_s23, %s33_s10  }
  0x3d   : > { %p42_p0 = por %p41_p9, %p40_p12  ;;  %p2348_p3 = por %p180_p2, %p40_p12 }
  0x3e   : > { %1929 = dma.hbm_to_vmem [thread:$0]  (!%p2294_p11), %s2826_s4, 2048, %s232_s12, [#allocation9], %s2810_s14, %s2810_s14, %s2812_s15  }
  0x3f   : > { %2827 = sst [smem:[#allocation17_spill]] %s2344_s11  ;;  %s248_s16 = sand.u32 1, %s2194_s23  }
  0x40   : > { %s2828_s13 = scalar_select %p2348_p3, 1, 0 }
  0x41   : > { %s1483_s17 = sshll.u32 %s2198_s24, 12  ;;  %s2354_s12 = sshll.u32 %s248_s16, 8 }
  0x42   : > { %s2829_s0 = sld [smem:[#allocation18_spill]]  ;;  %s252_s26 = scalar_lea.vmem [#allocation2], %s2354_s12 }
  0x43   : > { %s259_s30 = sshll.u32 %s252_s26, 4  ;;  %p2362_p11 = pnand %p1944_p13, %p42_p0  ;;  %s2366_s30 = int_to_ptr.vmem [resolvable:$true] %s259_s30 }
  0x44   : > { %s2371_s18 = scalar_lea.hbm %s2803_s1, %s1483_s17  ;;  %s2373_s19 = scalar_lea.sflag [#allocation3], %s248_s16 }
  0x45   : > { %p2068_p5 = pneg %p2362_p11 }
  0x48   : > { %s2359_s20 = scalar_lea.hbm %s2829_s0, %s1483_s17  ;;  %s2071_s2 = scalar_lea.hbm %s2829_s0, 8192 }
  0x49   : > { %s2066_s14 = scalar_lea.hbm %s2359_s20, 4096  ;;  %p2072_p1 = scmp.lt.s32.totalorder %s2359_s20, %s2829_s0 }
  0x4a   : > { %p2067_p2 = scmp.ne.s32.totalorder %s2359_s20, %s2066_s14  ;;  %p2073_p12 = scmp.lt.s32.totalorder %s2071_s2, %s2066_s14 }
  0x4c   : > { %p2069_p10 = pnand %p2068_p5, %p2067_p2  ;;  %p2074_p9 = por %p2073_p12, %p2072_p1 }
  0x4e   : > { %p2070_p7 = pneg %p2069_p10 }
  0x50   : > { %p2075_p13 = pnand %p2074_p9, %p2070_p7 }
  0x52   : > { %2078 = shalt.err (!%p2075_p13)
}
  0x53   : > { %s2079_s16 = scalar_lea.vmem %s2366_s30, 4096  ;;  %s2205_s15 = smov [#allocation2]  }
  0x54   : > { %p2080_p0 = scmp.ne.s32.totalorder %s2366_s30, %s2079_s16  ;;  %s2084_s17 = sshll.u32 %s2205_s15, 4  ;;  %s2085_s17 = int_to_ptr.vmem [resolvable:$false] %s2084_s17 }
  0x55   : > { %s2086_s8 = scalar_lea.vmem %s2085_s17, 8192  ;;  %p2087_p6 = scmp.lt.s32.totalorder %s2366_s30, %s2085_s17 }
  0x56   : > { %p2082_p2 = pnand %p2080_p0, %p2068_p5  ;;  %p2088_p3 = scmp.lt.s32.totalorder %s2086_s8, %s2079_s16 }
  0x58   : > { %p2083_p10 = pneg %p2082_p2  ;;  %p2089_p4 = por %p2088_p3, %p2087_p6 }
  0x5a   : > { %p2090_p1 = pnand %p2089_p4, %p2083_p10 }
  0x5c   : > { %2093 = shalt.err (!%p2090_p1)
}
  0x5d   : > { %s2831_s2 = smov 8   ;;  %s2832_s3 = smov 128  }
  0x5e   : > { %1933 = dma.hbm_to_vmem [thread:$0]  (!%p2362_p11), %s2359_s20, 4096, %s2366_s30, %s2373_s19, %s2832_s3, %s2832_s3, %s2831_s2  }
  0x5f   : > { %s273_s4 = scalar_lea.vmem [#allocation5], %s2354_s12  ;;  %s269_s10 = sand.u32 1, %s2198_s24  }
  0x60   : > { %s280_s14 = sshll.u32 %s273_s4, 4  ;;  %s270_s26 = scalar_lea.sflag [#allocation6], %s269_s10  ;;  %s2405_s14 = int_to_ptr.vmem [resolvable:$true] %s280_s14 }
  0x61   : > { %s2094_s16 = scalar_lea.hbm %s2371_s18, 4096  ;;  %s2099_s8 = scalar_lea.hbm %s2803_s1, 8192 }
  0x62   : > { %p2095_p4 = scmp.ne.s32.totalorder %s2371_s18, %s2094_s16  ;;  %p2100_p7 = scmp.lt.s32.totalorder %s2371_s18, %s2803_s1 }
  0x63   : > { %p2101_p12 = scmp.lt.s32.totalorder %s2099_s8, %s2094_s16 }
  0x64   : > { %p2097_p6 = pnand %p2095_p4, %p2068_p5 }
  0x65   : > { %p2102_p9 = por %p2101_p12, %p2100_p7 }
  0x66   : > { %p2098_p3 = pneg %p2097_p6 }
  0x68   : > { %p2103_p13 = pnand %p2102_p9, %p2098_p3 }
  0x6a   : > { %2106 = shalt.err (!%p2103_p13)
}
  0x6b   : > { %s2107_s12 = scalar_lea.vmem %s2405_s14, 4096  ;;  %s2206_s20 = smov [#allocation5]  }
  0x6c   : > { %p2108_p0 = scmp.ne.s32.totalorder %s2405_s14, %s2107_s12  ;;  %s2112_s30 = sshll.u32 %s2206_s20, 4  ;;  %s2113_s30 = int_to_ptr.vmem [resolvable:$false] %s2112_s30 }
  0x6d   : > { %s2114_s19 = scalar_lea.vmem %s2113_s30, 8192  ;;  %p2115_p1 = scmp.lt.s32.totalorder %s2405_s14, %s2113_s30 }
  0x6e   : > { %p2110_p2 = pnand %p2108_p0, %p2068_p5  ;;  %p2116_p4 = scmp.lt.s32.totalorder %s2114_s19, %s2107_s12 }
  0x70   : > { %p2111_p10 = pneg %p2110_p2  ;;  %p2117_p6 = por %p2116_p4, %p2115_p1 }
  0x72   : > { %p2118_p7 = pnand %p2117_p6, %p2111_p10 }
  0x74   : > { %2121 = shalt.err (!%p2118_p7)
}
  0x75   : > { %1936 = dma.hbm_to_vmem [thread:$0]  (!%p2362_p11), %s2371_s18, 4096, %s2405_s14, %s270_s26, %s2832_s3, %s2832_s3, %s2831_s2  }
  0x76   : > { %292 = sbr.rel (%p2285_p8) target bundleno = 873 (0x369), region = 44  ;;  %s2435_s0 = sand.u32 (!%p2285_p8), 1, %s2190_s22  }
  0x77   : > { %s2438_s11 = sshll.u32 (!%p2285_p8), %s2435_s0, 8  ;;  %s295_s4 = scalar_lea.sflag (!%p2285_p8), [#allocation3], %s2435_s0 }
  0x78   : > { %s2442_s7 = scalar_lea.vmem (!%p2285_p8), [#allocation2], %s2438_s11  ;;  %p2833_p5 = scmp.ne.s32.totalorder (!%p2285_p8), %s2820_s27, 0 }
  0x7b   : > { %2165 = dma.done.wait (%p2833_p5), %s295_s4, 4096  }
  0x7c   : > { %2167 = vsyncadd (%p2833_p5), %s295_s4, 4294963200  ;;  %s303_s29 = sand.u32 1, %s2266_s25   ;;  %s2450_s2 = scalar_lea.vmem [#allocation5], %s2438_s11 }
  0x7d   : > { %s304_s18 = scalar_lea.sflag [#allocation6], %s303_s29 }
  0x7e   : > { %2169 = dma.done.wait (%p2833_p5), %s304_s18, 4096  }
  0x7f   : > { %2171 = vsyncadd (%p2833_p5), %s304_s18, 4294963200  ;;  %p2834_p8 = scmp.eq.s32.totalorder %s2266_s25, 0 }
  0x81   : > { %2173 = dma.done.wait (%p2834_p8), [#allocation6], 2048   ;;  %p2835_p11 = pmov %p2834_p8 }
  0x82   : > { %p2836_p3 = pmov %p2834_p8 }
  0x83   : > { %2175 = vsyncadd (%p2835_p11), [#allocation6], 4294965248 }
  0x84   : > { %2177 = dma.done.wait (%p2836_p3), [#allocation9], 4096   ;;  %p2837_p12 = pmov %p2836_p3 }
  0x85   : > { %v403_v0 = vld [vmem:[#allocation7 + $0x78] sm:$0xff]  ;;  %v402_v1 = vld [vmem:[#allocation7 + $0x70] sm:$0xff]  ;;  %v401_v2 = vld [vmem:[#allocation7 + $0x68] sm:$0xff]  ;;  %s2660_s15 = scalar_lea.vmem [#allocation11], %s2438_s11  ;;  %s1485_s17 = sshll.u32 %s2266_s25, 12 }
  0x86   : > { %2179 = vsyncadd (%p2837_p12), [#allocation9], 4294963200  ;;  %1630 = vmatprep.subr.mxu0 %v403_v0  ;;  %v356_v3 = vld [vmem:[%s2442_s7] sm:$0xff]  ;;  %v399_v5 = vld [vmem:[#allocation7 + $0x58] sm:$0xff]  ;;  %s1332_s8 = sshll.u32 %s2660_s15, 4  ;;  %s2755_s30 = scalar_lea.hbm %s2808_s6, %s1485_s17  ;;  %s2757_s8 = int_to_ptr.vmem [resolvable:$true] %s1332_s8 }
  0x87   : > { %1631 = vmatpush3.xpose.msra.mxu0 %v403_v0  ;;  %1662 = vmatprep.mubr.f32.mxu0 %v356_v3  ;;  %v400_v4 = vld [vmem:[#allocation7 + $0x60] sm:$0xff]  ;;  %v398_v6 = vld [vmem:[#allocation7 + $0x50] sm:$0xff]  ;;  %v681_v7 = vld [vmem:[#allocation8 + $0x78] sm:$0xff]  ;;  %s1319_s19 = scalar_lea.sflag [#allocation4], %s2435_s0  ;;  %s2122_s25 = scalar_lea.vmem %s2757_s8, 4096 }
  0x88   : > { %1632 = vmatprep.subr.mxu0 %v402_v1  ;;  %v680_v8 = vld [vmem:[#allocation8 + $0x70] sm:$0xff]  ;;  %1710 = vmatprep.subr.mxu1 %v681_v7  ;;  %v397_v9 = vld [vmem:[#allocation7 + $0x48] sm:$0xff]  ;;  %v396_v11 = vld [vmem:[#allocation7 + $0x40] sm:$0xff]  ;;  %p2123_p9 = scmp.ne.s32.totalorder %s2757_s8, %s2122_s25  ;;  %p2838_p13 = scmp.ne.s32.totalorder %s2828_s13, 0 }
  0x89   : > { %1711 = vmatpush3.xpose.msra.mxu1 %v681_v7  ;;  %v679_v10 = vld [vmem:[#allocation8 + $0x68] sm:$0xff]  ;;  %v678_v12 = vld [vmem:[#allocation8 + $0x60] sm:$0xff]  ;;  %v395_v13 = vld [vmem:[#allocation7 + $0x38] sm:$0xff]  ;;  %s2207_s11 = smov [#allocation11]  }
  0x8a   : > { %1712 = vmatprep.subr.mxu1 %v680_v8  ;;  %v677_v14 = vld [vmem:[#allocation8 + $0x58] sm:$0xff]  ;;  %v394_v15 = vld [vmem:[#allocation7 + $0x30] sm:$0xff]  ;;  %v393_v17 = vld [vmem:[#allocation7 + $0x28] sm:$0xff]  ;;  %p2124_p0 = pnand %p2123_p9, %p2838_p13  ;;  %s2126_s4 = sshll.u32 %s2207_s11, 4  ;;  %s2127_s4 = int_to_ptr.vmem [resolvable:$false] %s2126_s4 }
  0x8b   : > { %1633 = vmatpush3.xpose.msra.mxu0 %v402_v1  ;;  %v676_v16 = vld [vmem:[#allocation8 + $0x50] sm:$0xff]  ;;  %v675_v18 = vld [vmem:[#allocation8 + $0x48] sm:$0xff]  ;;  %v392_v19 = vld [vmem:[#allocation7 + $0x20] sm:$0xff]  ;;  %p2129_p10 = scmp.lt.s32.totalorder %s2757_s8, %s2127_s4 }
  0x8c   : > { %1634 = vmatprep.subr.mxu0 %v401_v2  ;;  %v674_v20 = vld [vmem:[#allocation8 + $0x40] sm:$0xff]  ;;  %v391_v21 = vld [vmem:[#allocation7 + $0x18] sm:$0xff]  ;;  %v390_v23 = vld [vmem:[#allocation7 + $0x10] sm:$0xff]  ;;  %p2125_p2 = pneg %p2124_p0 }
  0x8d   : > { %1713 = vmatpush3.xpose.msra.mxu1 %v680_v8  ;;  %v673_v22 = vld [vmem:[#allocation8 + $0x38] sm:$0xff]  ;;  %v672_v24 = vld [vmem:[#allocation8 + $0x30] sm:$0xff]  ;;  %v389_v25 = vld [vmem:[#allocation7 + $0x8] sm:$0xff] }
  0x8e   : > { %1714 = vmatprep.subr.mxu1 %v679_v10  ;;  %v671_v26 = vld [vmem:[#allocation8 + $0x28] sm:$0xff]  ;;  %v388_v27 = vld [vmem:[#allocation7] sm:$0xff]  ;;  %v669_v29 = vld [vmem:[#allocation8 + $0x18] sm:$0xff] }
  0x8f   : > { %1635 = vmatpush3.xpose.msra.mxu0 %v401_v2  ;;  %v670_v28 = vld [vmem:[#allocation8 + $0x20] sm:$0xff]  ;;  %v357_v30 = vld [vmem:[%s2442_s7 + $0x8] sm:$0xff]  ;;  %v358_v31 = vld [vmem:[%s2442_s7 + $0x10] sm:$0xff] }
  0x90   : > { %1636 = vmatprep.subr.mxu0 %v400_v4  ;;  %v668_v32 = vld [vmem:[#allocation8 + $0x10] sm:$0xff]  ;;  %v359_v33 = vld [vmem:[%s2442_s7 + $0x18] sm:$0xff]  ;;  %v360_v34 = vld [vmem:[%s2442_s7 + $0x20] sm:$0xff] }
  0x91   : > { %1715 = vmatpush3.xpose.msra.mxu1 %v679_v10  ;;  %v361_v35 = vld [vmem:[%s2442_s7 + $0x28] sm:$0xff]  ;;  %v362_v36 = vld [vmem:[%s2442_s7 + $0x30] sm:$0xff]  ;;  %v363_v37 = vld [vmem:[%s2442_s7 + $0x38] sm:$0xff] }
  0x92   : > { %1716 = vmatprep.subr.mxu1 %v678_v12  ;;  %v364_v38 = vld [vmem:[%s2442_s7 + $0x40] sm:$0xff]  ;;  %v365_v39 = vld [vmem:[%s2442_s7 + $0x48] sm:$0xff]  ;;  %v366_v40 = vld [vmem:[%s2442_s7 + $0x50] sm:$0xff] }
  0x93   : > { %1637 = vmatpush3.xpose.msra.mxu0 %v400_v4  ;;  %v367_v41 = vld [vmem:[%s2442_s7 + $0x58] sm:$0xff]  ;;  %v368_v42 = vld [vmem:[%s2442_s7 + $0x60] sm:$0xff]  ;;  %v369_v43 = vld [vmem:[%s2442_s7 + $0x68] sm:$0xff] }
  0x94   : > { %1638 = vmatprep.subr.mxu0 %v399_v5  ;;  %v370_v44 = vld [vmem:[%s2442_s7 + $0x70] sm:$0xff]  ;;  %v371_v45 = vld [vmem:[%s2442_s7 + $0x78] sm:$0xff]  ;;  %v372_v46 = vld [vmem:[%s2442_s7 + $0x80] sm:$0xff] }
  0x95   : > { %1717 = vmatpush3.xpose.msra.mxu1 %v678_v12  ;;  %v373_v47 = vld [vmem:[%s2442_s7 + $0x88] sm:$0xff]  ;;  %v374_v48 = vld [vmem:[%s2442_s7 + $0x90] sm:$0xff]  ;;  %v375_v49 = vld [vmem:[%s2442_s7 + $0x98] sm:$0xff] }
  0x96   : > { %1718 = vmatprep.subr.mxu1 %v677_v14  ;;  %v376_v50 = vld [vmem:[%s2442_s7 + $0xa0] sm:$0xff]  ;;  %v377_v51 = vld [vmem:[%s2442_s7 + $0xa8] sm:$0xff]  ;;  %v378_v52 = vld [vmem:[%s2442_s7 + $0xb0] sm:$0xff] }
  0x97   : > { %1639 = vmatpush3.xpose.msra.mxu0 %v399_v5  ;;  %v379_v53 = vld [vmem:[%s2442_s7 + $0xb8] sm:$0xff]  ;;  %v380_v54 = vld [vmem:[%s2442_s7 + $0xc0] sm:$0xff]  ;;  %v381_v55 = vld [vmem:[%s2442_s7 + $0xc8] sm:$0xff] }
  0x98   : > { %1640 = vmatprep.subr.mxu0 %v398_v6  ;;  %v382_v56 = vld [vmem:[%s2442_s7 + $0xd0] sm:$0xff]  ;;  %v383_v57 = vld [vmem:[%s2442_s7 + $0xd8] sm:$0xff]  ;;  %v384_v58 = vld [vmem:[%s2442_s7 + $0xe0] sm:$0xff] }
  0x99   : > { %1719 = vmatpush3.xpose.msra.mxu1 %v677_v14  ;;  %v385_v59 = vld [vmem:[%s2442_s7 + $0xe8] sm:$0xff]  ;;  %v386_v60 = vld [vmem:[%s2442_s7 + $0xf0] sm:$0xff]  ;;  %v387_v61 = vld [vmem:[%s2442_s7 + $0xf8] sm:$0xff]  ;;  %s2128_s7 = scalar_lea.vmem %s2127_s4, 8192 }
  0x9a   : > { %1720 = vmatprep.subr.mxu1 %v676_v16  ;;  %v667_v62 = vld [vmem:[#allocation8 + $0x8] sm:$0xff]  ;;  %v666_v63 = vld [vmem:[#allocation8] sm:$0xff]  ;;  %v959_v0 = vld [vmem:[#allocation10 + $0x78] sm:$0xff]  ;;  %p2130_p1 = scmp.lt.s32.totalorder %s2128_s7, %s2122_s25 }
  0x9b   : > { %1641 = vmatpush3.xpose.msra.mxu0 %v398_v6  ;;  %v2496_v1 = vld [vmem:[#allocation10 + $0x70] sm:$0xff]  ;;  %v2499_v2 = vld [vmem:[#allocation10 + $0x68] sm:$0xff]  ;;  %v2503_v3 = vld [vmem:[#allocation10 + $0x60] sm:$0xff] }
  0x9c   : > { %1642 = vmatprep.subr.mxu0 %v397_v9  ;;  %v2507_v4 = vld [vmem:[#allocation10 + $0x58] sm:$0xff]  ;;  %v2511_v5 = vld [vmem:[#allocation10 + $0x50] sm:$0xff]  ;;  %v2515_v6 = vld [vmem:[#allocation10 + $0x48] sm:$0xff]  ;;  %p2131_p4 = por %p2130_p1, %p2129_p10 }
  0x9d   : > { %1721 = vmatpush3.xpose.msra.mxu1 %v676_v16  ;;  %v2519_v7 = vld [vmem:[#allocation10 + $0x40] sm:$0xff]  ;;  %v2523_v8 = vld [vmem:[#allocation10 + $0x38] sm:$0xff]  ;;  %v2531_v10 = vld [vmem:[#allocation10 + $0x28] sm:$0xff] }
  0x9e   : > { %1722 = vmatprep.subr.mxu1 %v675_v18  ;;  %v2539_v12 = vld [vmem:[#allocation10 + $0x18] sm:$0xff]  ;;  %v2551_v14 = vld [vmem:[%s2807_s5] ss:$0 sm:$0xff]  ;;  %p2132_p6 = pnand %p2131_p4, %p2125_p2 }
  0x9f   : > { %1643 = vmatpush3.xpose.msra.mxu0 %v397_v9  ;;  %v2527_v9 = vld [vmem:[#allocation10 + $0x30] sm:$0xff] }
  0xa0   : > { %1644 = vmatprep.subr.mxu0 %v396_v11 }
  0xa1   : > { %1723 = vmatpush3.xpose.msra.mxu1 %v675_v18 }
  0xa2   : > { %1724 = vmatprep.subr.mxu1 %v674_v20 }
  0xa3   : > { %1645 = vmatpush3.xpose.msra.mxu0 %v396_v11  ;;  %v2535_v11 = vld [vmem:[#allocation10 + $0x20] sm:$0xff] }
  0xa4   : > { %1646 = vmatprep.subr.mxu0 %v395_v13 }
  0xa5   : > { %1725 = vmatpush3.xpose.msra.mxu1 %v674_v20 }
  0xa6   : > { %1726 = vmatprep.subr.mxu1 %v673_v22 }
  0xa7   : > { %1647 = vmatpush3.xpose.msra.mxu0 %v395_v13  ;;  %v2543_v13 = vld [vmem:[#allocation10 + $0x10] sm:$0xff] }
  0xa8   : > { %1648 = vmatprep.subr.mxu0 %v394_v15 }
  0xa9   : > { %1727 = vmatpush3.xpose.msra.mxu1 %v673_v22 }
  0xaa   : > { %1728 = vmatprep.subr.mxu1 %v672_v24 }
  0xab   : > { %1649 = vmatpush3.xpose.msra.mxu0 %v394_v15 }
  0xac   : > { %1650 = vmatprep.subr.mxu0 %v393_v17 }
  0xad   : > { %1729 = vmatpush3.xpose.msra.mxu1 %v672_v24 }
  0xae   : > { %1730 = vmatprep.subr.mxu1 %v671_v26 }
  0xaf   : > { %1651 = vmatpush3.xpose.msra.mxu0 %v393_v17 }
  0xb0   : > { %1652 = vmatprep.subr.mxu0 %v392_v19 }
  0xb1   : > { %1731 = vmatpush3.xpose.msra.mxu1 %v671_v26 }
  0xb2   : > { %1732 = vmatprep.subr.mxu1 %v670_v28 }
  0xb3   : > { %1653 = vmatpush3.xpose.msra.mxu0 %v392_v19 }
  0xb4   : > { %1654 = vmatprep.subr.mxu0 %v391_v21 }
  0xb5   : > { %1733 = vmatpush3.xpose.msra.mxu1 %v670_v28 }
  0xb6   : > { %1734 = vmatprep.subr.mxu1 %v669_v29 }
  0xb7   : > { %1655 = vmatpush3.xpose.msra.mxu0 %v391_v21 }
  0xb8   : > { %1656 = vmatprep.subr.mxu0 %v390_v23 }
  0xb9   : > { %1735 = vmatpush3.xpose.msra.mxu1 %v669_v29 }
  0xba   : > { %1736 = vmatprep.subr.mxu1 %v668_v32 }
  0xbb   : > { %1657 = vmatpush3.xpose.msra.mxu0 %v390_v23 }
  0xbc   : > { %1658 = vmatprep.subr.mxu0 %v389_v25 }
  0xbd   : > { %1737 = vmatpush3.xpose.msra.mxu1 %v668_v32 }
  0xbe   : > { %1738 = vmatprep.subr.mxu1 %v667_v62 }
  0xbf   : > { %1659 = vmatpush3.xpose.msra.mxu0 %v389_v25 }
  0xc0   : > { %1660 = vmatprep.subr.mxu0 %v388_v27 }
  0xc1   : > { %1739 = vmatpush3.xpose.msra.mxu1 %v667_v62 }
  0xc2   : > { %1740 = vmatprep.subr.mxu1 %v666_v63 }
  0xc3   : > { %1661 = vmatpush3.xpose.msra.mxu0 %v388_v27 }
  0xc4   : > { %1790 = vmatprep.subr.mxu0 %v959_v0 }
  0xc5   : > { %1741 = vmatpush3.xpose.msra.mxu1 %v666_v63 }
  0xc6   : > { %1663 = vmatmul.mubr.f32.vlgmr.msra.gmra.mxu0 %v357_v30  ;;  %1870 = vmatprep.subr.mxu1 %v959_v0 }
  0xc7   : > { %1665 = vmatprep.mubr.f32.mxu0 %v358_v31  ;;  %1791 = vmatpush3.xpose.msra.mxu0 %v959_v0 }
  0xc8   : > { %1792 = vmatprep.subr.mxu0 %v2496_v1 }
  0xca   : > { %1666 = vmatmul.mubr.f32.gmra.mxu0 %v359_v33 }
  0xcb   : > { %1668 = vmatprep.mubr.f32.mxu0 %v360_v34  ;;  %1793 = vmatpush3.xpose.msra.mxu0 %v2496_v1 }
  0xcc   : > { %1794 = vmatprep.subr.mxu0 %v2499_v2 }
  0xce   : > { %1669 = vmatmul.mubr.f32.gmra.mxu0 %v361_v35 }
  0xcf   : > { %1671 = vmatprep.mubr.f32.mxu0 %v362_v36  ;;  %1795 = vmatpush3.xpose.msra.mxu0 %v2499_v2 }
  0xd0   : > { %1796 = vmatprep.subr.mxu0 %v2503_v3 }
  0xd2   : > { %1672 = vmatmul.mubr.f32.gmra.mxu0 %v363_v37 }
  0xd3   : > { %1674 = vmatprep.mubr.f32.mxu0 %v364_v38  ;;  %1797 = vmatpush3.xpose.msra.mxu0 %v2503_v3 }
  0xd4   : > { %1798 = vmatprep.subr.mxu0 %v2507_v4 }
  0xd6   : > { %1675 = vmatmul.mubr.f32.gmra.mxu0 %v365_v39 }
  0xd7   : > { %1677 = vmatprep.mubr.f32.mxu0 %v366_v40  ;;  %1799 = vmatpush3.xpose.msra.mxu0 %v2507_v4 }
  0xd8   : > { %1800 = vmatprep.subr.mxu0 %v2511_v5 }
  0xda   : > { %1678 = vmatmul.mubr.f32.gmra.mxu0 %v367_v41 }
  0xdb   : > { %1680 = vmatprep.mubr.f32.mxu0 %v368_v42  ;;  %1801 = vmatpush3.xpose.msra.mxu0 %v2511_v5 }
  0xdc   : > { %1802 = vmatprep.subr.mxu0 %v2515_v6 }
  0xde   : > { %1681 = vmatmul.mubr.f32.gmra.mxu0 %v369_v43 }
  0xdf   : > { %1683 = vmatprep.mubr.f32.mxu0 %v370_v44  ;;  %1803 = vmatpush3.xpose.msra.mxu0 %v2515_v6 }
  0xe0   : > { %1804 = vmatprep.subr.mxu0 %v2519_v7 }
  0xe2   : > { %1684 = vmatmul.mubr.f32.gmra.mxu0 %v371_v45 }
  0xe3   : > { %1686 = vmatprep.mubr.f32.mxu0 %v372_v46  ;;  %1805 = vmatpush3.xpose.msra.mxu0 %v2519_v7 }
  0xe4   : > { %1806 = vmatprep.subr.mxu0 %v2523_v8 }
  0xe6   : > { %1687 = vmatmul.mubr.f32.gmra.mxu0 %v373_v47 }
  0xe7   : > { %1689 = vmatprep.mubr.f32.mxu0 %v374_v48  ;;  %1807 = vmatpush3.xpose.msra.mxu0 %v2523_v8 }
  0xe8   : > { %1808 = vmatprep.subr.mxu0 %v2527_v9 }
  0xea   : > { %1690 = vmatmul.mubr.f32.gmra.mxu0 %v375_v49 }
  0xeb   : > { %1692 = vmatprep.mubr.f32.mxu0 %v376_v50  ;;  %1809 = vmatpush3.xpose.msra.mxu0 %v2527_v9 }
  0xec   : > { %1810 = vmatprep.subr.mxu0 %v2531_v10 }
  0xee   : > { %1693 = vmatmul.mubr.f32.gmra.mxu0 %v377_v51 }
  0xef   : > { %1695 = vmatprep.mubr.f32.mxu0 %v378_v52  ;;  %1811 = vmatpush3.xpose.msra.mxu0 %v2531_v10 }
  0xf0   : > { %1812 = vmatprep.subr.mxu0 %v2535_v11 }
  0xf2   : > { %1696 = vmatmul.mubr.f32.gmra.mxu0 %v379_v53 }
  0xf3   : > { %1698 = vmatprep.mubr.f32.mxu0 %v380_v54  ;;  %1813 = vmatpush3.xpose.msra.mxu0 %v2535_v11 }
  0xf4   : > { %1814 = vmatprep.subr.mxu0 %v2539_v12 }
  0xf6   : > { %1699 = vmatmul.mubr.f32.gmra.mxu0 %v381_v55 }
  0xf7   : > { %1701 = vmatprep.mubr.f32.mxu0 %v382_v56  ;;  %1815 = vmatpush3.xpose.msra.mxu0 %v2539_v12 }
  0xf8   : > { %1816 = vmatprep.subr.mxu0 %v2543_v13 }
  0xfa   : > { %1702 = vmatmul.mubr.f32.gmra.mxu0 %v383_v57 }
  0xfb   : > { %1704 = vmatprep.mubr.f32.mxu0 %v384_v58  ;;  %1817 = vmatpush3.xpose.msra.mxu0 %v2543_v13 }
  0xfe   : > { %1705 = vmatmul.mubr.f32.gmra.mxu0 %v385_v59 }
  0xff   : > { %1707 = vmatprep.mubr.f32.mxu0 %v386_v60 }
 0x102   : > { %1708 = vmatmul.mubr.f32.gmra.mxu0 %v387_v61 }
 0x186   : > { %v1664_v15 = vpop.f32.mrf.mxu0 }
 0x187   : > { %v481_v16 = vadd.f32 %v1664_v15, %v2551_v14 }
 0x188   : > { %v475_v17 = vpop.f32.mrf.mxu0 }
 0x189   : > { %v476_v18 = vadd.f32 %v2551_v14, %v475_v17  ;;  %v635_v21 = vmax.f32 %v481_v16, 0.0 }
 0x18a   : > { %v1667_v19 = vpop.f32.mrf.mxu0 }
 0x18b   : > { %v634_v20 = vmax.f32 %v476_v18, 0.0  ;;  %v491_v22 = vadd.f32 %v1667_v19, %v2551_v14 }
 0x18c   : > { %v485_v23 = vpop.f32.mrf.mxu0 }
 0x18d   : > { %v486_v24 = vadd.f32 %v2551_v14, %v485_v23  ;;  %1742 = vmatprep.mubr.f32.mxu1 %v634_v20  ;;  %v637_v27 = vmax.f32 %v491_v22, 0.0 }
 0x18e   : > { %v1670_v25 = vpop.f32.mrf.mxu0  ;;  %1743 = vmatmul.mubr.f32.vlgmr.msra.gmra.mxu1 %v635_v21 }
 0x18f   : > { %v636_v26 = vmax.f32 %v486_v24, 0.0  ;;  %1886 = vmatpush3.xpose.msra.mxu1 %v959_v0  ;;  %v501_v28 = vadd.f32 %v1670_v25, %v2551_v14 }
 0x190   : > { %v495_v29 = vpop.f32.mrf.mxu0  ;;  %1871 = vmatprep.subr.mxu1 %v2496_v1 }
 0x191   : > { %v496_v30 = vadd.f32 %v2551_v14, %v495_v29  ;;  %1745 = vmatprep.mubr.f32.mxu1 %v636_v26  ;;  %v639_v33 = vmax.f32 %v501_v28, 0.0 }
 0x192   : > { %v1673_v31 = vpop.f32.mrf.mxu0  ;;  %1746 = vmatmul.mubr.f32.gmra.mxu1 %v637_v27 }
 0x193   : > { %v638_v32 = vmax.f32 %v496_v30, 0.0  ;;  %1887 = vmatpush3.xpose.msra.mxu1 %v2496_v1  ;;  %v511_v34 = vadd.f32 %v1673_v31, %v2551_v14 }
 0x194   : > { %v505_v35 = vpop.f32.mrf.mxu0  ;;  %1872 = vmatprep.subr.mxu1 %v2499_v2 }
 0x195   : > { %v506_v36 = vadd.f32 %v2551_v14, %v505_v35  ;;  %1748 = vmatprep.mubr.f32.mxu1 %v638_v32  ;;  %v641_v39 = vmax.f32 %v511_v34, 0.0 }
 0x196   : > { %v1676_v37 = vpop.f32.mrf.mxu0  ;;  %1749 = vmatmul.mubr.f32.gmra.mxu1 %v639_v33 }
 0x197   : > { %v640_v38 = vmax.f32 %v506_v36, 0.0  ;;  %1888 = vmatpush3.xpose.msra.mxu1 %v2499_v2  ;;  %v521_v40 = vadd.f32 %v1676_v37, %v2551_v14 }
 0x198   : > { %v515_v41 = vpop.f32.mrf.mxu0  ;;  %1873 = vmatprep.subr.mxu1 %v2503_v3 }
 0x199   : > { %v516_v42 = vadd.f32 %v2551_v14, %v515_v41  ;;  %1751 = vmatprep.mubr.f32.mxu1 %v640_v38  ;;  %v643_v45 = vmax.f32 %v521_v40, 0.0 }
 0x19a   : > { %v1679_v43 = vpop.f32.mrf.mxu0  ;;  %1752 = vmatmul.mubr.f32.gmra.mxu1 %v641_v39 }
 0x19b   : > { %v642_v44 = vmax.f32 %v516_v42, 0.0  ;;  %1889 = vmatpush3.xpose.msra.mxu1 %v2503_v3  ;;  %v531_v46 = vadd.f32 %v1679_v43, %v2551_v14 }
 0x19c   : > { %v525_v47 = vpop.f32.mrf.mxu0  ;;  %1874 = vmatprep.subr.mxu1 %v2507_v4 }
 0x19d   : > { %v526_v48 = vadd.f32 %v2551_v14, %v525_v47  ;;  %1754 = vmatprep.mubr.f32.mxu1 %v642_v44  ;;  %v645_v51 = vmax.f32 %v531_v46, 0.0 }
 0x19e   : > { %v1682_v49 = vpop.f32.mrf.mxu0  ;;  %1755 = vmatmul.mubr.f32.gmra.mxu1 %v643_v45 }
 0x19f   : > { %v644_v50 = vmax.f32 %v526_v48, 0.0  ;;  %1890 = vmatpush3.xpose.msra.mxu1 %v2507_v4  ;;  %v541_v52 = vadd.f32 %v1682_v49, %v2551_v14  ;;  %v945_v49 = vld [vmem:[#allocation10 + $0x8] sm:$0xff] }
 0x1a0   : > { %v535_v53 = vpop.f32.mrf.mxu0  ;;  %1875 = vmatprep.subr.mxu1 %v2511_v5  ;;  %1818 = vmatprep.subr.mxu0 %v945_v49 }
 0x1a1   : > { %v536_v54 = vadd.f32 %v2551_v14, %v535_v53  ;;  %1757 = vmatprep.mubr.f32.mxu1 %v644_v50  ;;  %v647_v57 = vmax.f32 %v541_v52, 0.0  ;;  %1819 = vmatpush3.xpose.msra.mxu0 %v945_v49  ;;  %v944_v50 = vld [vmem:[#allocation10] sm:$0xff] }
 0x1a2   : > { %v1685_v55 = vpop.f32.mrf.mxu0  ;;  %1758 = vmatmul.mubr.f32.gmra.mxu1 %v645_v51  ;;  %1820 = vmatprep.subr.mxu0 %v944_v50 }
 0x1a3   : > { %v646_v56 = vmax.f32 %v536_v54, 0.0  ;;  %1891 = vmatpush3.xpose.msra.mxu1 %v2511_v5  ;;  %v551_v58 = vadd.f32 %v1685_v55, %v2551_v14 }
 0x1a4   : > { %v545_v59 = vpop.f32.mrf.mxu0  ;;  %1876 = vmatprep.subr.mxu1 %v2515_v6 }
 0x1a5   : > { %v546_v60 = vadd.f32 %v2551_v14, %v545_v59  ;;  %1760 = vmatprep.mubr.f32.mxu1 %v646_v56  ;;  %v649_v63 = vmax.f32 %v551_v58, 0.0  ;;  %1821 = vmatpush3.xpose.msra.mxu0 %v944_v50 }
 0x1a6   : > { %v1688_v61 = vpop.f32.mrf.mxu0  ;;  %1761 = vmatmul.mubr.f32.gmra.mxu1 %v647_v57 }
 0x1a7   : > { %v648_v62 = vmax.f32 %v546_v60, 0.0  ;;  %1892 = vmatpush3.xpose.msra.mxu1 %v2515_v6  ;;  %v561_v0 = vadd.f32 %v1688_v61, %v2551_v14 }
 0x1a8   : > { %v555_v1 = vpop.f32.mrf.mxu0  ;;  %1877 = vmatprep.subr.mxu1 %v2519_v7 }
 0x1a9   : > { %v556_v2 = vadd.f32 %v2551_v14, %v555_v1  ;;  %1763 = vmatprep.mubr.f32.mxu1 %v648_v62  ;;  %v651_v5 = vmax.f32 %v561_v0, 0.0 }
 0x1aa   : > { %v1691_v3 = vpop.f32.mrf.mxu0  ;;  %1764 = vmatmul.mubr.f32.gmra.mxu1 %v649_v63 }
 0x1ab   : > { %v650_v4 = vmax.f32 %v556_v2, 0.0  ;;  %1893 = vmatpush3.xpose.msra.mxu1 %v2519_v7  ;;  %v571_v15 = vadd.f32 %v1691_v3, %v2551_v14 }
 0x1ac   : > { %v565_v16 = vpop.f32.mrf.mxu0  ;;  %1878 = vmatprep.subr.mxu1 %v2523_v8 }
 0x1ad   : > { %v566_v6 = vadd.f32 %v2551_v14, %v565_v16  ;;  %1766 = vmatprep.mubr.f32.mxu1 %v650_v4  ;;  %v653_v19 = vmax.f32 %v571_v15, 0.0 }
 0x1ae   : > { %v1694_v17 = vpop.f32.mrf.mxu0  ;;  %1767 = vmatmul.mubr.f32.gmra.mxu1 %v651_v5 }
 0x1af   : > { %v652_v18 = vmax.f32 %v566_v6, 0.0  ;;  %1894 = vmatpush3.xpose.msra.mxu1 %v2523_v8  ;;  %v581_v20 = vadd.f32 %v1694_v17, %v2551_v14 }
 0x1b0   : > { %v575_v21 = vpop.f32.mrf.mxu0  ;;  %1879 = vmatprep.subr.mxu1 %v2527_v9 }
 0x1b1   : > { %v576_v7 = vadd.f32 %v2551_v14, %v575_v21  ;;  %1769 = vmatprep.mubr.f32.mxu1 %v652_v18  ;;  %v655_v24 = vmax.f32 %v581_v20, 0.0 }
 0x1b2   : > { %v1697_v22 = vpop.f32.mrf.mxu0  ;;  %1770 = vmatmul.mubr.f32.gmra.mxu1 %v653_v19 }
 0x1b3   : > { %v654_v23 = vmax.f32 %v576_v7, 0.0  ;;  %1895 = vmatpush3.xpose.msra.mxu1 %v2527_v9  ;;  %v591_v25 = vadd.f32 %v1697_v22, %v2551_v14 }
 0x1b4   : > { %v585_v26 = vpop.f32.mrf.mxu0  ;;  %1880 = vmatprep.subr.mxu1 %v2531_v10 }
 0x1b5   : > { %v586_v8 = vadd.f32 %v2551_v14, %v585_v26  ;;  %1772 = vmatprep.mubr.f32.mxu1 %v654_v23  ;;  %v657_v29 = vmax.f32 %v591_v25, 0.0 }
 0x1b6   : > { %v1700_v27 = vpop.f32.mrf.mxu0  ;;  %1773 = vmatmul.mubr.f32.gmra.mxu1 %v655_v24 }
 0x1b7   : > { %v656_v28 = vmax.f32 %v586_v8, 0.0  ;;  %1896 = vmatpush3.xpose.msra.mxu1 %v2531_v10  ;;  %v601_v30 = vadd.f32 %v1700_v27, %v2551_v14 }
 0x1b8   : > { %v595_v31 = vpop.f32.mrf.mxu0  ;;  %1881 = vmatprep.subr.mxu1 %v2535_v11 }
 0x1b9   : > { %v596_v9 = vadd.f32 %v2551_v14, %v595_v31  ;;  %1775 = vmatprep.mubr.f32.mxu1 %v656_v28  ;;  %v659_v34 = vmax.f32 %v601_v30, 0.0 }
 0x1ba   : > { %v1703_v32 = vpop.f32.mrf.mxu0  ;;  %1776 = vmatmul.mubr.f32.gmra.mxu1 %v657_v29 }
 0x1bb   : > { %v658_v33 = vmax.f32 %v596_v9, 0.0  ;;  %1897 = vmatpush3.xpose.msra.mxu1 %v2535_v11  ;;  %v611_v35 = vadd.f32 %v1703_v32, %v2551_v14 }
 0x1bc   : > { %v605_v36 = vpop.f32.mrf.mxu0  ;;  %1882 = vmatprep.subr.mxu1 %v2539_v12 }
 0x1bd   : > { %v606_v10 = vadd.f32 %v2551_v14, %v605_v36  ;;  %1778 = vmatprep.mubr.f32.mxu1 %v658_v33  ;;  %v661_v39 = vmax.f32 %v611_v35, 0.0 }
 0x1be   : > { %v1706_v37 = vpop.f32.mrf.mxu0  ;;  %1779 = vmatmul.mubr.f32.gmra.mxu1 %v659_v34 }
 0x1bf   : > { %v660_v38 = vmax.f32 %v606_v10, 0.0  ;;  %1898 = vmatpush3.xpose.msra.mxu1 %v2539_v12  ;;  %v621_v40 = vadd.f32 %v1706_v37, %v2551_v14 }
 0x1c0   : > { %v615_v41 = vpop.f32.mrf.mxu0  ;;  %1883 = vmatprep.subr.mxu1 %v2543_v13 }
 0x1c1   : > { %v616_v11 = vadd.f32 %v2551_v14, %v615_v41  ;;  %1781 = vmatprep.mubr.f32.mxu1 %v660_v38  ;;  %v663_v44 = vmax.f32 %v621_v40, 0.0 }
 0x1c2   : > { %v1709_v42 = vpop.f32.mrf.mxu0  ;;  %1782 = vmatmul.mubr.f32.gmra.mxu1 %v661_v39 }
 0x1c3   : > { %v662_v43 = vmax.f32 %v616_v11, 0.0  ;;  %1899 = vmatpush3.xpose.msra.mxu1 %v2543_v13  ;;  %v631_v45 = vadd.f32 %v1709_v42, %v2551_v14  ;;  %v2614_v13 = vld [vmem:[%s2807_s5 + $0x1] ss:$0 sm:$0xff] }
 0x1c4   : > { %v625_v46 = vpop.f32.mrf.mxu0  ;;  %1884 = vmatprep.subr.mxu1 %v945_v49 }
 0x1c5   : > { %v626_v12 = vadd.f32 %v2551_v14, %v625_v46  ;;  %1784 = vmatprep.mubr.f32.mxu1 %v662_v43  ;;  %v665_v48 = vmax.f32 %v631_v45, 0.0 }
 0x1c6   : > { %1785 = vmatmul.mubr.f32.gmra.mxu1 %v663_v44 }
 0x1c7   : > { %v664_v47 = vmax.f32 %v626_v12, 0.0  ;;  %1900 = vmatpush3.xpose.msra.mxu1 %v945_v49 }
 0x1c8   : > { %1885 = vmatprep.subr.mxu1 %v944_v50 }
 0x1c9   : > { %1787 = vmatprep.mubr.f32.mxu1 %v664_v47 }
 0x1ca   : > { %1788 = vmatmul.mubr.f32.gmra.mxu1 %v665_v48 }
 0x1cb   : > { %1901 = vmatpush3.xpose.msra.mxu1 %v944_v50 }
 0x24e   : > { %v1744_v14 = vpop.f32.mrf.mxu1 }
 0x24f   : > { %v759_v51 = vadd.f32 %v1744_v14, %v2614_v13 }
 0x250   : > { %v753_v52 = vpop.f32.mrf.mxu1 }
 0x251   : > { %v754_v53 = vadd.f32 %v2614_v13, %v753_v52  ;;  %v913_v56 = vmax.f32 %v759_v51, 0.0 }
 0x252   : > { %v1747_v54 = vpop.f32.mrf.mxu1 }
 0x253   : > { %v912_v55 = vmax.f32 %v754_v53, 0.0  ;;  %v769_v57 = vadd.f32 %v1747_v54, %v2614_v13 }
 0x254   : > { %v763_v58 = vpop.f32.mrf.mxu1 }
 0x255   : > { %v764_v59 = vadd.f32 %v2614_v13, %v763_v58  ;;  %1822 = vmatprep.mubr.f32.mxu0 %v912_v55  ;;  %v915_v62 = vmax.f32 %v769_v57, 0.0 }
 0x256   : > { %v1750_v60 = vpop.f32.mrf.mxu1  ;;  %1823 = vmatmul.mubr.f32.vlgmr.msra.gmra.mxu0 %v913_v56 }
 0x257   : > { %v914_v61 = vmax.f32 %v764_v59, 0.0  ;;  %v779_v63 = vadd.f32 %v1750_v60, %v2614_v13 }
 0x258   : > { %v773_v0 = vpop.f32.mrf.mxu1 }
 0x259   : > { %v774_v1 = vadd.f32 %v2614_v13, %v773_v0  ;;  %1825 = vmatprep.mubr.f32.mxu0 %v914_v61  ;;  %v917_v4 = vmax.f32 %v779_v63, 0.0 }
 0x25a   : > { %v1753_v2 = vpop.f32.mrf.mxu1  ;;  %1826 = vmatmul.mubr.f32.gmra.mxu0 %v915_v62 }
 0x25b   : > { %v916_v3 = vmax.f32 %v774_v1, 0.0  ;;  %v789_v5 = vadd.f32 %v1753_v2, %v2614_v13 }
 0x25c   : > { %v783_v15 = vpop.f32.mrf.mxu1 }
 0x25d   : > { %v784_v16 = vadd.f32 %v2614_v13, %v783_v15  ;;  %1828 = vmatprep.mubr.f32.mxu0 %v916_v3  ;;  %v919_v18 = vmax.f32 %v789_v5, 0.0 }
 0x25e   : > { %v1756_v6 = vpop.f32.mrf.mxu1  ;;  %1829 = vmatmul.mubr.f32.gmra.mxu0 %v917_v4 }
 0x25f   : > { %v918_v17 = vmax.f32 %v784_v16, 0.0  ;;  %v799_v19 = vadd.f32 %v1756_v6, %v2614_v13 }
 0x260   : > { %v793_v20 = vpop.f32.mrf.mxu1 }
 0x261   : > { %v794_v21 = vadd.f32 %v2614_v13, %v793_v20  ;;  %1831 = vmatprep.mubr.f32.mxu0 %v918_v17  ;;  %v921_v23 = vmax.f32 %v799_v19, 0.0 }
 0x262   : > { %v1759_v7 = vpop.f32.mrf.mxu1  ;;  %1832 = vmatmul.mubr.f32.gmra.mxu0 %v919_v18 }
 0x263   : > { %v920_v22 = vmax.f32 %v794_v21, 0.0  ;;  %v809_v24 = vadd.f32 %v1759_v7, %v2614_v13 }
 0x264   : > { %v803_v25 = vpop.f32.mrf.mxu1 }
 0x265   : > { %v804_v26 = vadd.f32 %v2614_v13, %v803_v25  ;;  %1834 = vmatprep.mubr.f32.mxu0 %v920_v22  ;;  %v923_v28 = vmax.f32 %v809_v24, 0.0 }
 0x266   : > { %v1762_v8 = vpop.f32.mrf.mxu1  ;;  %1835 = vmatmul.mubr.f32.gmra.mxu0 %v921_v23 }
 0x267   : > { %v922_v27 = vmax.f32 %v804_v26, 0.0  ;;  %v819_v29 = vadd.f32 %v1762_v8, %v2614_v13  ;;  %v2651_v26 = vld [vmem:[%s2807_s5 + $0x2] ss:$0 sm:$0xff] }
 0x268   : > { %v813_v30 = vpop.f32.mrf.mxu1 }
 0x269   : > { %v814_v31 = vadd.f32 %v2614_v13, %v813_v30  ;;  %1837 = vmatprep.mubr.f32.mxu0 %v922_v27  ;;  %v925_v33 = vmax.f32 %v819_v29, 0.0 }
 0x26a   : > { %v1765_v9 = vpop.f32.mrf.mxu1  ;;  %1838 = vmatmul.mubr.f32.gmra.mxu0 %v923_v28  ;;  %v1223_v28 = vld [vmem:[%s2450_s2 + $0x8] sm:$0xff] }
 0x26b   : > { %v924_v32 = vmax.f32 %v814_v31, 0.0  ;;  %v829_v34 = vadd.f32 %v1765_v9, %v2614_v13  ;;  %v1222_v31 = vld [vmem:[%s2450_s2] sm:$0xff] }
 0x26c   : > { %v823_v35 = vpop.f32.mrf.mxu1 }
 0x26d   : > { %v824_v36 = vadd.f32 %v2614_v13, %v823_v35  ;;  %1840 = vmatprep.mubr.f32.mxu0 %v924_v32  ;;  %v927_v38 = vmax.f32 %v829_v34, 0.0  ;;  %v1225_v35 = vld [vmem:[%s2450_s2 + $0x18] sm:$0xff] }
 0x26e   : > { %v1768_v10 = vpop.f32.mrf.mxu1  ;;  %1841 = vmatmul.mubr.f32.gmra.mxu0 %v925_v33 }
 0x26f   : > { %v926_v37 = vmax.f32 %v824_v36, 0.0  ;;  %v839_v39 = vadd.f32 %v1768_v10, %v2614_v13 }
 0x270   : > { %v833_v40 = vpop.f32.mrf.mxu1 }
 0x271   : > { %v834_v41 = vadd.f32 %v2614_v13, %v833_v40  ;;  %1843 = vmatprep.mubr.f32.mxu0 %v926_v37  ;;  %v929_v43 = vmax.f32 %v839_v39, 0.0  ;;  %v1224_v39 = vld [vmem:[%s2450_s2 + $0x10] sm:$0xff] }
 0x272   : > { %v1771_v11 = vpop.f32.mrf.mxu1  ;;  %1844 = vmatmul.mubr.f32.gmra.mxu0 %v927_v38 }
 0x273   : > { %v928_v42 = vmax.f32 %v834_v41, 0.0  ;;  %v849_v44 = vadd.f32 %v1771_v11, %v2614_v13 }
 0x274   : > { %v843_v45 = vpop.f32.mrf.mxu1 }
 0x275   : > { %v844_v46 = vadd.f32 %v2614_v13, %v843_v45  ;;  %1846 = vmatprep.mubr.f32.mxu1 %v928_v42  ;;  %v931_v48 = vmax.f32 %v849_v44, 0.0 }
 0x276   : > { %v1774_v12 = vpop.f32.mrf.mxu1  ;;  %1847 = vmatmul.mubr.f32.vlgmr.msra.gmra.mxu1 %v929_v43  ;;  %v1227_v43 = vld [vmem:[%s2450_s2 + $0x28] sm:$0xff] }
 0x277   : > { %v930_v47 = vmax.f32 %v844_v46, 0.0  ;;  %v859_v49 = vadd.f32 %v1774_v12, %v2614_v13 }
 0x278   : > { %v853_v50 = vpop.f32.mrf.mxu1 }
 0x279   : > { %v854_v14 = vadd.f32 %v2614_v13, %v853_v50  ;;  %1849 = vmatprep.mubr.f32.mxu1 %v930_v47  ;;  %v933_v53 = vmax.f32 %v859_v49, 0.0  ;;  %v1226_v47 = vld [vmem:[%s2450_s2 + $0x20] sm:$0xff] }
 0x27a   : > { %v1777_v51 = vpop.f32.mrf.mxu1  ;;  %1850 = vmatmul.mubr.f32.gmra.mxu1 %v931_v48 }
 0x27b   : > { %v932_v52 = vmax.f32 %v854_v14, 0.0  ;;  %v869_v54 = vadd.f32 %v1777_v51, %v2614_v13  ;;  %v1229_v51 = vld [vmem:[%s2450_s2 + $0x38] sm:$0xff] }
 0x27c   : > { %v863_v55 = vpop.f32.mrf.mxu1 }
 0x27d   : > { %v864_v56 = vadd.f32 %v2614_v13, %v863_v55  ;;  %1852 = vmatprep.mubr.f32.mxu1 %v932_v52  ;;  %v935_v59 = vmax.f32 %v869_v54, 0.0 }
 0x27e   : > { %v1780_v57 = vpop.f32.mrf.mxu1  ;;  %1853 = vmatmul.mubr.f32.gmra.mxu1 %v933_v53 }
 0x27f   : > { %v934_v58 = vmax.f32 %v864_v56, 0.0  ;;  %v879_v60 = vadd.f32 %v1780_v57, %v2614_v13  ;;  %v1228_v56 = vld [vmem:[%s2450_s2 + $0x30] sm:$0xff] }
 0x280   : > { %v873_v61 = vpop.f32.mrf.mxu1 }
 0x281   : > { %v874_v62 = vadd.f32 %v2614_v13, %v873_v61  ;;  %1855 = vmatprep.mubr.f32.mxu1 %v934_v58  ;;  %v937_v1 = vmax.f32 %v879_v60, 0.0  ;;  %v1231_v61 = vld [vmem:[%s2450_s2 + $0x48] sm:$0xff] }
 0x282   : > { %v1783_v63 = vpop.f32.mrf.mxu1  ;;  %1856 = vmatmul.mubr.f32.gmra.mxu1 %v935_v59 }
 0x283   : > { %v936_v0 = vmax.f32 %v874_v62, 0.0  ;;  %v889_v2 = vadd.f32 %v1783_v63, %v2614_v13 }
 0x284   : > { %v883_v3 = vpop.f32.mrf.mxu1 }
 0x285   : > { %v884_v4 = vadd.f32 %v2614_v13, %v883_v3  ;;  %1858 = vmatprep.mubr.f32.mxu1 %v936_v0  ;;  %v939_v16 = vmax.f32 %v889_v2, 0.0  ;;  %v1230_v2 = vld [vmem:[%s2450_s2 + $0x40] sm:$0xff] }
 0x286   : > { %v1786_v5 = vpop.f32.mrf.mxu1  ;;  %1859 = vmatmul.mubr.f32.gmra.mxu1 %v937_v1 }
 0x287   : > { %v938_v15 = vmax.f32 %v884_v4, 0.0  ;;  %v899_v6 = vadd.f32 %v1786_v5, %v2614_v13 }
 0x288   : > { %v893_v17 = vpop.f32.mrf.mxu1 }
 0x289   : > { %v894_v18 = vadd.f32 %v2614_v13, %v893_v17  ;;  %1861 = vmatprep.mubr.f32.mxu1 %v938_v15  ;;  %v941_v21 = vmax.f32 %v899_v6, 0.0 }
 0x28a   : > { %v1789_v19 = vpop.f32.mrf.mxu1  ;;  %1862 = vmatmul.mubr.f32.gmra.mxu1 %v939_v16  ;;  %v1233_v16 = vld [vmem:[%s2450_s2 + $0x58] sm:$0xff] }
 0x28b   : > { %v940_v20 = vmax.f32 %v894_v18, 0.0  ;;  %v909_v7 = vadd.f32 %v1789_v19, %v2614_v13 }
 0x28c   : > { %v903_v22 = vpop.f32.mrf.mxu1 }
 0x28d   : > { %v904_v23 = vadd.f32 %v2614_v13, %v903_v22  ;;  %1864 = vmatprep.mubr.f32.mxu1 %v940_v20  ;;  %v943_v25 = vmax.f32 %v909_v7, 0.0  ;;  %v1232_v20 = vld [vmem:[%s2450_s2 + $0x50] sm:$0xff] }
 0x28e   : > { %1865 = vmatmul.mubr.f32.gmra.mxu1 %v941_v21 }
 0x28f   : > { %v942_v24 = vmax.f32 %v904_v23, 0.0 }
 0x291   : > { %1867 = vmatprep.mubr.f32.mxu1 %v942_v24  ;;  %v1235_v24 = vld [vmem:[%s2450_s2 + $0x68] sm:$0xff] }
 0x292   : > { %1868 = vmatmul.mubr.f32.gmra.mxu1 %v943_v25 }
 0x316   : > { %v1824_v8 = vpop.f32.mrf.mxu0 }
 0x317   : > { %v1037_v27 = vadd.f32 %v1824_v8, %v2651_v26 }
 0x318   : > { %v1031_v29 = vpop.f32.mrf.mxu0 }
 0x319   : > { %v1191_v13 = vmax.f32 %v1037_v27, 0.0  ;;  %v1032_v30 = vadd.f32 %v2651_v26, %v1031_v29  ;;  %v1234_v29 = vld [vmem:[%s2450_s2 + $0x60] sm:$0xff] }
 0x31a   : > { %v1827_v9 = vpop.f32.mrf.mxu0 }
 0x31b   : > { %v1255_v32 = vmul.f32 %v1223_v28, %v1191_v13  ;;  %v1190_v33 = vmax.f32 %v1032_v30, 0.0  ;;  %v1047_v34 = vadd.f32 %v1827_v9, %v2651_v26 }
 0x31c   : > { %v1041_v36 = vpop.f32.mrf.mxu0 }
 0x31d   : > { %1287 = vst [vmem:[%s2660_s15 + $0x8] sm:$0xff] %v1255_v32  ;;  %v1254_v10 = vmul.f32 %v1222_v31, %v1190_v33  ;;  %v1193_v37 = vmax.f32 %v1047_v34, 0.0  ;;  %v1042_v38 = vadd.f32 %v2651_v26, %v1041_v36  ;;  %v1237_v32 = vld [vmem:[%s2450_s2 + $0x78] sm:$0xff] }
 0x31e   : > { %v1830_v40 = vpop.f32.mrf.mxu0 }
 0x31f   : > { %1286 = vst [vmem:[%s2660_s15] sm:$0xff] %v1254_v10  ;;  %v1257_v41 = vmul.f32 %v1225_v35, %v1193_v37  ;;  %v1192_v11 = vmax.f32 %v1042_v38, 0.0  ;;  %v1057_v42 = vadd.f32 %v1830_v40, %v2651_v26  ;;  %v1236_v10 = vld [vmem:[%s2450_s2 + $0x70] sm:$0xff] }
 0x320   : > { %v1051_v44 = vpop.f32.mrf.mxu0 }
 0x321   : > { %1289 = vst [vmem:[%s2660_s15 + $0x18] sm:$0xff] %v1257_v41  ;;  %v1256_v45 = vmul.f32 %v1224_v39, %v1192_v11  ;;  %v1195_v46 = vmax.f32 %v1057_v42, 0.0  ;;  %v1052_v12 = vadd.f32 %v2651_v26, %v1051_v44  ;;  %v1239_v41 = vld [vmem:[%s2450_s2 + $0x88] sm:$0xff] }
 0x322   : > { %v1833_v48 = vpop.f32.mrf.mxu0 }
 0x323   : > { %1288 = vst [vmem:[%s2660_s15 + $0x10] sm:$0xff] %v1256_v45  ;;  %v1259_v49 = vmul.f32 %v1227_v43, %v1195_v46  ;;  %v1194_v50 = vmax.f32 %v1052_v12, 0.0  ;;  %v1067_v14 = vadd.f32 %v1833_v48, %v2651_v26  ;;  %v1238_v45 = vld [vmem:[%s2450_s2 + $0x80] sm:$0xff] }
 0x324   : > { %v1061_v52 = vpop.f32.mrf.mxu0 }
 0x325   : > { %1291 = vst [vmem:[%s2660_s15 + $0x28] sm:$0xff] %v1259_v49  ;;  %v1258_v53 = vmul.f32 %v1226_v47, %v1194_v50  ;;  %v1197_v54 = vmax.f32 %v1067_v14, 0.0  ;;  %v1062_v55 = vadd.f32 %v2651_v26, %v1061_v52  ;;  %v1241_v49 = vld [vmem:[%s2450_s2 + $0x98] sm:$0xff] }
 0x326   : > { %v1836_v57 = vpop.f32.mrf.mxu0 }
 0x327   : > { %1290 = vst [vmem:[%s2660_s15 + $0x20] sm:$0xff] %v1258_v53  ;;  %v1261_v58 = vmul.f32 %v1229_v51, %v1197_v54  ;;  %v1196_v59 = vmax.f32 %v1062_v55, 0.0  ;;  %v1077_v60 = vadd.f32 %v1836_v57, %v2651_v26  ;;  %v1240_v53 = vld [vmem:[%s2450_s2 + $0x90] sm:$0xff] }
 0x328   : > { %v1071_v62 = vpop.f32.mrf.mxu0 }
 0x329   : > { %1293 = vst [vmem:[%s2660_s15 + $0x38] sm:$0xff] %v1261_v58  ;;  %v1260_v63 = vmul.f32 %v1228_v56, %v1196_v59  ;;  %v1199_v0 = vmax.f32 %v1077_v60, 0.0  ;;  %v1072_v1 = vadd.f32 %v2651_v26, %v1071_v62  ;;  %v1243_v58 = vld [vmem:[%s2450_s2 + $0xa8] sm:$0xff] }
 0x32a   : > { %v1839_v3 = vpop.f32.mrf.mxu0 }
 0x32b   : > { %1292 = vst [vmem:[%s2660_s15 + $0x30] sm:$0xff] %v1260_v63  ;;  %v1263_v4 = vmul.f32 %v1231_v61, %v1199_v0  ;;  %v1198_v5 = vmax.f32 %v1072_v1, 0.0  ;;  %v1087_v15 = vadd.f32 %v1839_v3, %v2651_v26  ;;  %v1242_v63 = vld [vmem:[%s2450_s2 + $0xa0] sm:$0xff] }
 0x32c   : > { %v1081_v6 = vpop.f32.mrf.mxu0 }
 0x32d   : > { %1295 = vst [vmem:[%s2660_s15 + $0x48] sm:$0xff] %v1263_v4  ;;  %v1262_v17 = vmul.f32 %v1230_v2, %v1198_v5  ;;  %v1201_v18 = vmax.f32 %v1087_v15, 0.0  ;;  %v1082_v19 = vadd.f32 %v2651_v26, %v1081_v6  ;;  %v1245_v4 = vld [vmem:[%s2450_s2 + $0xb8] sm:$0xff] }
 0x32e   : > { %v1842_v21 = vpop.f32.mrf.mxu0 }
 0x32f   : > { %1294 = vst [vmem:[%s2660_s15 + $0x40] sm:$0xff] %v1262_v17  ;;  %v1265_v7 = vmul.f32 %v1233_v16, %v1201_v18  ;;  %v1200_v22 = vmax.f32 %v1082_v19, 0.0  ;;  %v1097_v23 = vadd.f32 %v1842_v21, %v2651_v26  ;;  %v1244_v17 = vld [vmem:[%s2450_s2 + $0xb0] sm:$0xff] }
 0x330   : > { %v1091_v25 = vpop.f32.mrf.mxu0 }
 0x331   : > { %1297 = vst [vmem:[%s2660_s15 + $0x58] sm:$0xff] %v1265_v7  ;;  %v1264_v8 = vmul.f32 %v1232_v20, %v1200_v22  ;;  %v1203_v27 = vmax.f32 %v1097_v23, 0.0  ;;  %v1092_v28 = vadd.f32 %v2651_v26, %v1091_v25  ;;  %v1247_v7 = vld [vmem:[%s2450_s2 + $0xc8] sm:$0xff] }
 0x332   : > { %v1845_v13 = vpop.f32.mrf.mxu0 }
 0x333   : > { %1296 = vst [vmem:[%s2660_s15 + $0x50] sm:$0xff] %v1264_v8  ;;  %v1267_v30 = vmul.f32 %v1235_v24, %v1203_v27  ;;  %v1202_v31 = vmax.f32 %v1092_v28, 0.0  ;;  %v1107_v9 = vadd.f32 %v1845_v13, %v2651_v26  ;;  %v1246_v8 = vld [vmem:[%s2450_s2 + $0xc0] sm:$0xff] }
 0x334   : > { %v1101_v33 = vpop.f32.mrf.mxu0 }
 0x335   : > { %1299 = vst [vmem:[%s2660_s15 + $0x68] sm:$0xff] %v1267_v30  ;;  %v1266_v34 = vmul.f32 %v1234_v29, %v1202_v31  ;;  %v1205_v35 = vmax.f32 %v1107_v9, 0.0  ;;  %v1102_v36 = vadd.f32 %v2651_v26, %v1101_v33  ;;  %v1249_v30 = vld [vmem:[%s2450_s2 + $0xd8] sm:$0xff] }
 0x336   : > { %v1848_v37 = vpop.f32.mrf.mxu1 }
 0x337   : > { %1298 = vst [vmem:[%s2660_s15 + $0x60] sm:$0xff] %v1266_v34  ;;  %v1269_v38 = vmul.f32 %v1237_v32, %v1205_v35  ;;  %v1204_v39 = vmax.f32 %v1102_v36, 0.0  ;;  %v1117_v40 = vadd.f32 %v1848_v37, %v2651_v26  ;;  %v1248_v34 = vld [vmem:[%s2450_s2 + $0xd0] sm:$0xff] }
 0x338   : > { %v1111_v11 = vpop.f32.mrf.mxu1 }
 0x339   : > { %1301 = vst [vmem:[%s2660_s15 + $0x78] sm:$0xff] %v1269_v38  ;;  %v1268_v42 = vmul.f32 %v1236_v10, %v1204_v39  ;;  %v1207_v43 = vmax.f32 %v1117_v40, 0.0  ;;  %v1112_v44 = vadd.f32 %v2651_v26, %v1111_v11  ;;  %v1251_v38 = vld [vmem:[%s2450_s2 + $0xe8] sm:$0xff] }
 0x33a   : > { %v1851_v46 = vpop.f32.mrf.mxu1 }
 0x33b   : > { %1300 = vst [vmem:[%s2660_s15 + $0x70] sm:$0xff] %v1268_v42  ;;  %v1271_v12 = vmul.f32 %v1239_v41, %v1207_v43  ;;  %v1206_v47 = vmax.f32 %v1112_v44, 0.0  ;;  %v1127_v48 = vadd.f32 %v1851_v46, %v2651_v26  ;;  %v1250_v42 = vld [vmem:[%s2450_s2 + $0xe0] sm:$0xff] }
 0x33c   : > { %v1121_v50 = vpop.f32.mrf.mxu1 }
 0x33d   : > { %1303 = vst [vmem:[%s2660_s15 + $0x88] sm:$0xff] %v1271_v12  ;;  %v1270_v14 = vmul.f32 %v1238_v45, %v1206_v47  ;;  %v1209_v51 = vmax.f32 %v1127_v48, 0.0  ;;  %v1122_v52 = vadd.f32 %v2651_v26, %v1121_v50  ;;  %v1253_v12 = vld [vmem:[%s2450_s2 + $0xf8] sm:$0xff] }
 0x33e   : > { %v1854_v54 = vpop.f32.mrf.mxu1 }
 0x33f   : > { %1302 = vst [vmem:[%s2660_s15 + $0x80] sm:$0xff] %v1270_v14  ;;  %v1273_v55 = vmul.f32 %v1241_v49, %v1209_v51  ;;  %v1208_v56 = vmax.f32 %v1122_v52, 0.0  ;;  %v1137_v57 = vadd.f32 %v1854_v54, %v2651_v26  ;;  %v1252_v14 = vld [vmem:[%s2450_s2 + $0xf0] sm:$0xff] }
 0x340   : > { %v1131_v59 = vpop.f32.mrf.mxu1 }
 0x341   : > { %1305 = vst [vmem:[%s2660_s15 + $0x98] sm:$0xff] %v1273_v55  ;;  %v1272_v60 = vmul.f32 %v1240_v53, %v1208_v56  ;;  %v1211_v61 = vmax.f32 %v1137_v57, 0.0  ;;  %v1132_v62 = vadd.f32 %v2651_v26, %v1131_v59 }
 0x342   : > { %v1857_v0 = vpop.f32.mrf.mxu1 }
 0x343   : > { %1304 = vst [vmem:[%s2660_s15 + $0x90] sm:$0xff] %v1272_v60  ;;  %v1275_v1 = vmul.f32 %v1243_v58, %v1211_v61  ;;  %v1210_v2 = vmax.f32 %v1132_v62, 0.0  ;;  %v1147_v3 = vadd.f32 %v1857_v0, %v2651_v26 }
 0x344   : > { %v1141_v5 = vpop.f32.mrf.mxu1 }
 0x345   : > { %1307 = vst [vmem:[%s2660_s15 + $0xa8] sm:$0xff] %v1275_v1  ;;  %v1274_v15 = vmul.f32 %v1242_v63, %v1210_v2  ;;  %v1213_v16 = vmax.f32 %v1147_v3, 0.0  ;;  %v1142_v6 = vadd.f32 %v2651_v26, %v1141_v5 }
 0x346   : > { %v1860_v18 = vpop.f32.mrf.mxu1 }
 0x347   : > { %1306 = vst [vmem:[%s2660_s15 + $0xa0] sm:$0xff] %v1274_v15  ;;  %v1277_v19 = vmul.f32 %v1245_v4, %v1213_v16  ;;  %v1212_v20 = vmax.f32 %v1142_v6, 0.0  ;;  %v1157_v21 = vadd.f32 %v1860_v18, %v2651_v26 }
 0x348   : > { %v1151_v22 = vpop.f32.mrf.mxu1 }
 0x349   : > { %1309 = vst [vmem:[%s2660_s15 + $0xb8] sm:$0xff] %v1277_v19  ;;  %v1276_v23 = vmul.f32 %v1244_v17, %v1212_v20  ;;  %v1215_v24 = vmax.f32 %v1157_v21, 0.0  ;;  %v1152_v25 = vadd.f32 %v2651_v26, %v1151_v22 }
 0x34a   : > { %v1863_v27 = vpop.f32.mrf.mxu1 }
 0x34b   : > { %1308 = vst [vmem:[%s2660_s15 + $0xb0] sm:$0xff] %v1276_v23  ;;  %v1279_v28 = vmul.f32 %v1247_v7, %v1215_v24  ;;  %v1214_v29 = vmax.f32 %v1152_v25, 0.0  ;;  %v1167_v13 = vadd.f32 %v1863_v27, %v2651_v26 }
 0x34c   : > { %v1161_v31 = vpop.f32.mrf.mxu1 }
 0x34d   : > { %1311 = vst [vmem:[%s2660_s15 + $0xc8] sm:$0xff] %v1279_v28  ;;  %v1278_v9 = vmul.f32 %v1246_v8, %v1214_v29  ;;  %v1217_v32 = vmax.f32 %v1167_v13, 0.0  ;;  %v1162_v33 = vadd.f32 %v2651_v26, %v1161_v31 }
 0x34e   : > { %v1866_v35 = vpop.f32.mrf.mxu1 }
 0x34f   : > { %1310 = vst [vmem:[%s2660_s15 + $0xc0] sm:$0xff] %v1278_v9  ;;  %v1281_v36 = vmul.f32 %v1249_v30, %v1217_v32  ;;  %v1216_v10 = vmax.f32 %v1162_v33, 0.0  ;;  %v1177_v37 = vadd.f32 %v1866_v35, %v2651_v26 }
 0x350   : > { %v1171_v39 = vpop.f32.mrf.mxu1 }
 0x351   : > { %1313 = vst [vmem:[%s2660_s15 + $0xd8] sm:$0xff] %v1281_v36  ;;  %v1280_v40 = vmul.f32 %v1248_v34, %v1216_v10  ;;  %v1219_v41 = vmax.f32 %v1177_v37, 0.0  ;;  %v1172_v11 = vadd.f32 %v2651_v26, %v1171_v39 }
 0x352   : > { %v1869_v43 = vpop.f32.mrf.mxu1 }
 0x353   : > { %1312 = vst [vmem:[%s2660_s15 + $0xd0] sm:$0xff] %v1280_v40  ;;  %v1283_v44 = vmul.f32 %v1251_v38, %v1219_v41  ;;  %v1218_v45 = vmax.f32 %v1172_v11, 0.0  ;;  %v1187_v46 = vadd.f32 %v1869_v43, %v2651_v26 }
 0x354   : > { %v1181_v47 = vpop.f32.mrf.mxu1 }
 0x355   : > { %1315 = vst [vmem:[%s2660_s15 + $0xe8] sm:$0xff] %v1283_v44  ;;  %v1282_v48 = vmul.f32 %v1250_v42, %v1218_v45  ;;  %v1221_v49 = vmax.f32 %v1187_v46, 0.0  ;;  %v1182_v50 = vadd.f32 %v2651_v26, %v1181_v47 }
 0x357   : > { %1314 = vst [vmem:[%s2660_s15 + $0xe0] sm:$0xff] %v1282_v48  ;;  %v1285_v51 = vmul.f32 %v1253_v12, %v1221_v49  ;;  %v1220_v52 = vmax.f32 %v1182_v50, 0.0 }
 0x359   : > { %1317 = vst [vmem:[%s2660_s15 + $0xf8] sm:$0xff] %v1285_v51  ;;  %v1284_v53 = vmul.f32 %v1252_v14, %v1220_v52 }
 0x35b   : > { %1316 = vst [vmem:[%s2660_s15 + $0xf0] sm:$0xff] %v1284_v53 }
 0x35c   : > { %2135 = shalt.err (!%p2132_p6)
}
 0x35d   : > { %s2136_s29 = scalar_lea.hbm %s2755_s30, 4096  ;;  %s2140_s27 = scalar_lea.hbm %s2808_s6, 8192 }
 0x35e   : > { %p2137_p7 = scmp.ne.s32.totalorder %s2755_s30, %s2136_s29  ;;  %p2141_p11 = scmp.lt.s32.totalorder %s2755_s30, %s2808_s6 }
 0x35f   : > { %p2142_p3 = scmp.lt.s32.totalorder %s2140_s27, %s2136_s29 }
 0x360   : > { %p2138_p5 = pnand %p2137_p7, %p2838_p13 }
 0x361   : > { %p2143_p12 = por %p2142_p3, %p2141_p11 }
 0x362   : > { %p2139_p8 = pneg %p2138_p5 }
 0x364   : > { %p2144_p9 = pnand %p2143_p12, %p2139_p8 }
 0x366   : > { %2147 = shalt.err (!%p2144_p9)
}
 0x367   : > { %s2208_s10 = smov 128   ;;  %s2209_s26 = smov 8  }
 0x368   : > { %1918 = dma.vmem_to_hbm [thread:$0]  (%p2838_p13), %s2757_s8, 4096, %s2755_s30, %s1319_s19, %s2208_s10, %s2208_s10, %s2209_s26  }
 0x369 PF: > { %s1347_s16 = sand.u32 1, %s2186_s21   ;;  %p2839_p0 = scmp.ne.s32.totalorder %s2821_s28, 0 }
 0x36a   : > { %p2840_p2 = scmp.ge.s32.totalorder %s2198_s24, 2  ;;  %s1348_s15 = scalar_lea.sflag [#allocation4], %s1347_s16 }
 0x36c   : > { %p1938_p10 = pnand %p2840_p2, %p2839_p0 }
 0x36e   : > { %p1939_p1 = pneg %p1938_p10 }
 0x370   : > { %2181 = dma.done.wait (%p1939_p1), %s1348_s15, 4096  }
 0x371   : > { %2183 = vsyncadd (%p1939_p1), %s1348_s15, 4294963200  ;;  %s2841_s17 = sld [smem:[#allocation17_spill]]  ;;  %p23_p4 = scmp.ge.s32.totalorder %s2334_s9, 4  }
 0x372   : > { %s2842_s21 = smov %s2190_s22  ;;  %s2843_s22 = smov %s2194_s23 }
 0x373   : > { %s2845_s24 = smov %s2334_s9  ;;  %25 = sbr.rel (!%p23_p4) target bundleno = 13 (0xd), region = 114 }
 0x377   : > { %s2844_s23 = smov %s2841_s17 }
 0x378   :  { %1353 = vsyncpa [#allocation3], 1 }
 0x379   :  { %1355 = vsyncpa [#allocation3 + $0x1], 1 }
 0x37a   :  { %1356 = vsyncpa [#allocation6], 1 }
 0x37b   :  { %1358 = vsyncpa [#allocation6 + $0x1], 1 }
 0x37c   :  { %1359 = vsyncpa [#allocation9], 1 }
 0x37d   :  { %1360 = vsyncpa [#allocation4], 1 }
 0x37e   :  { %1362 = vsyncpa [#allocation4 + $0x1], 1 }

</bundles_post_ra>
